<compile_context>
chip_gen: v7x
topology: tpu7x:2x2x1
jax: 0.10.0
libtpu: 0.0.40
codegen_flags: <defaults>
</compile_context>

<pallas_src>
import functools

import jax
import jax.numpy as jnp
from jax.experimental import pallas as pl
from jax.experimental.pallas import tpu as pltpu

HP = 128  # lane-padded gate/hidden width (real hidden_size = 20 lives in lanes 0:20)


def gru_seq_kernel(T, B, xs_ref, h0_ref, wx_ref, bx_ref, whrz_ref, whh_ref,
                   out_ref):
    """Whole-sequence GRU recurrence in one kernel invocation.

    xs_ref   : (T*B, I)      flattened inputs (resident)
    h0_ref   : (B, HP)       zero-padded initial hidden (resident)
    wx_ref   : (I, 3*HP)     fused+padded [Wxr|Wxz|Wxh]^T (resident)
    bx_ref   : (1, 3*HP)     fused+padded x-side biases (resident)
    whrz_ref : (HP, 2*HP)    fused+padded [Whr|Whz]^T (resident)
    whh_ref  : (HP, HP)      padded Whh^T (resident)
    out_ref  : (T, B, HP)    all hidden states (resident, stored once)
    """
    # One batched MXU call for every timestep's x-side projections
    # (biases pre-added here, so zero bias adds / broadcasts inside the loop).
    xproj = (
        jnp.dot(xs_ref[...], wx_ref[...], preferred_element_type=jnp.float32)
        + bx_ref[...]
    )  # (T*B, 3*HP)

    whrz = whrz_ref[...]
    whh = whh_ref[...]

    h = h0_ref[...].astype(jnp.float32)  # (B, HP), padded lanes are 0

    for t in range(T):  # static unroll; only 2 MXU pushes on the serial path
        xp = xproj[t * B:(t + 1) * B, :]                 # (B, 3*HP) static slice

        # reset & update gates together: sigmoid([x@Wxr | x@Wxz] + h@[Whr|Whz])
        rz = jax.nn.sigmoid(
            xp[:, :2 * HP]
            + jnp.dot(h, whrz, preferred_element_type=jnp.float32)
        )                                                # (B, 2*HP)
        r = rz[:, :HP]
        z = rz[:, HP:2 * HP]

        # candidate: tanh(x@Wxh + (r*h)@Whh)
        c = jnp.tanh(
            xp[:, 2 * HP:]
            + jnp.dot(r * h, whh, preferred_element_type=jnp.float32)
        )                                                # (B, HP)

        h = z * h + (1.0 - z) * c
        out_ref[t] = h                                   # lane-dense 128-wide store


def prepare_params(params, input_size, hidden_size):
    """One-time host-side prep: transpose, fuse, and lane-pad to HP=128.

    Padded rows/columns are zero-filled so padded lanes of the recurrent state
    stay exactly 0 and never leak into real lanes.
    """
    I, H = input_size, hidden_size

    wx = jnp.zeros((I, 3 * HP), jnp.float32)
    wx = wx.at[:, 0:H].set(params["Wxr_w"].T)
    wx = wx.at[:, HP:HP + H].set(params["Wxz_w"].T)
    wx = wx.at[:, 2 * HP:2 * HP + H].set(params["Wxh_w"].T)

    bx = jnp.zeros((1, 3 * HP), jnp.float32)
    bx = bx.at[0, 0:H].set(params["Wxr_b"])
    bx = bx.at[0, HP:HP + H].set(params["Wxz_b"])
    bx = bx.at[0, 2 * HP:2 * HP + H].set(params["Wxh_b"])

    whrz = jnp.zeros((HP, 2 * HP), jnp.float32)
    whrz = whrz.at[:H, 0:H].set(params["Whr_w"].T)
    whrz = whrz.at[:H, HP:HP + H].set(params["Whz_w"].T)

    whh = jnp.zeros((HP, HP), jnp.float32)
    whh = whh.at[:H, :H].set(params["Whh_w"].T)

    return {"wx": wx, "bx": bx, "whrz": whrz, "whh": whh}


@jax.jit
def gru_encoder_sequence(xs, h0, prep):
    """Run the GRU encoder over a whole sequence in one Pallas kernel.

    xs: (T, B, I), h0: (B, H).  Returns (all_hidden (T, B, H), final (B, H)).
    """
    T, B, I = xs.shape
    H = h0.shape[1]

    xs2d = xs.reshape(T * B, I)
    h0p = jnp.zeros((B, HP), jnp.float32).at[:, :H].set(h0)

    def const_spec(shape):
        return pl.BlockSpec(shape, lambda i: (0,) * len(shape))

    flops = (2 * T * B * I * 3 * HP          # batched x-projection
             + T * 2 * B * HP * 3 * HP)      # per-step fused h-matmuls
    transcendentals = T * B * 3 * HP
    bytes_accessed = 4 * (T * B * I + B * HP + I * 3 * HP + 3 * HP
                          + HP * 2 * HP + HP * HP + T * B * HP)

    hs_p = pl.pallas_call(
        functools.partial(gru_seq_kernel, T, B),
        out_shape=jax.ShapeDtypeStruct((T, B, HP), jnp.float32),
        grid=(1,),
        in_specs=[
            const_spec((T * B, I)),     # xs (resident, single DMA)
            const_spec((B, HP)),        # h0 (padded)
            const_spec((I, 3 * HP)),    # fused x-weights
            const_spec((1, 3 * HP)),    # fused x-biases
            const_spec((HP, 2 * HP)),   # fused [Whr|Whz]
            const_spec((HP, HP)),       # Whh
        ],
        out_specs=const_spec((T, B, HP)),
        compiler_params=pltpu.CompilerParams(
            dimension_semantics=("arbitrary",)),
        cost_estimate=pl.CostEstimate(
            flops=flops,
            transcendentals=transcendentals,
            bytes_accessed=bytes_accessed),
    )(xs2d, h0p, prep["wx"], prep["bx"], prep["whrz"], prep["whh"])

    hs = hs_p[:, :, :H]   # drop the zero-filled padded lanes
    return hs, hs[-1]


def gru_encoder_step(x, hidden, prep):
    """Single-step forward (matches GRUEncoder.forward(x, hidden))."""
    _, h_new = gru_encoder_sequence(x[None], hidden, prep)
    return h_new


def init_params(key, input_size, hidden_size):
    """Deterministic synthetic params matching the nn.Linear shapes."""
    keys = jax.random.split(key, 9)

    def lin_w(k, out_f, in_f):
        bound = 1.0 / jnp.sqrt(in_f)
        return jax.random.uniform(k, (out_f, in_f), jnp.float32, -bound, bound)

    def lin_b(k, out_f, in_f):
        bound = 1.0 / jnp.sqrt(in_f)
        return jax.random.uniform(k, (out_f,), jnp.float32, -bound, bound)

    return {
        "Wxr_w": lin_w(keys[0], hidden_size, input_size),
        "Wxr_b": lin_b(keys[1], hidden_size, input_size),
        "Whr_w": lin_w(keys[2], hidden_size, hidden_size),
        "Wxz_w": lin_w(keys[3], hidden_size, input_size),
        "Wxz_b": lin_b(keys[4], hidden_size, input_size),
        "Whz_w": lin_w(keys[5], hidden_size, hidden_size),
        "Wxh_w": lin_w(keys[6], hidden_size, input_size),
        "Wxh_b": lin_b(keys[7], hidden_size, input_size),
        "Whh_w": lin_w(keys[8], hidden_size, hidden_size),
    }


def init_hidden(batch_size, hidden_size):
    return jnp.zeros((batch_size, hidden_size), jnp.float32)


def gru_encoder_step_ref(x, h, p):
    """Pure-JAX reference mirroring the PyTorch forward exactly."""
    sig = jax.nn.sigmoid
    r = sig(x @ p["Wxr_w"].T + p["Wxr_b"] + h @ p["Whr_w"].T)
    z = sig(x @ p["Wxz_w"].T + p["Wxz_b"] + h @ p["Whz_w"].T)
    c = jnp.tanh(x @ p["Wxh_w"].T + p["Wxh_b"] + (r * h) @ p["Whh_w"].T)
    return z * h + (1.0 - z) * c


if __name__ == "__main__":
    batch_size = 4
    input_size = 10
    hidden_size = 20
    seq_len = 8

    key = jax.random.PRNGKey(0)
    pkey, xkey = jax.random.split(key)
    params = init_params(pkey, input_size, hidden_size)
    prep = prepare_params(params, input_size, hidden_size)  # one-time fuse/pad

    xs = jax.random.normal(xkey, (seq_len, batch_size, input_size), jnp.float32)
    h0 = init_hidden(batch_size, hidden_size)

    # Entire sequence in a single fused Pallas kernel invocation.
    hs, h_final = gru_encoder_sequence(xs, h0, prep)
    h_final = jax.block_until_ready(h_final)

    # Pure-JAX reference: step-by-step recurrence.
    h_ref = h0
    hs_ref = []
    for t in range(seq_len):
        h_ref = gru_encoder_step_ref(xs[t], h_ref, params)
        hs_ref.append(h_ref)
    hs_ref = jnp.stack(hs_ref, axis=0)

    assert jnp.allclose(hs, hs_ref, atol=1e-5, rtol=1e-5)
    assert jnp.allclose(h_final, hs_ref[-1], atol=1e-5, rtol=1e-5)

    # Single-step API (matches GRUEncoder.forward) also goes through the kernel.
    h1 = gru_encoder_step(xs[0], h0, prep)
    h1 = jax.block_until_ready(h1)
    assert jnp.allclose(h1, gru_encoder_step_ref(xs[0], h0, params),
                        atol=1e-5, rtol=1e-5)

    print("KERNEL_OK")
</pallas_src>

<mosaic_0001>
module attributes {stable_mosaic.version = 11 : i64} {
  func.func @gru_seq_kernel(%arg0: i32, %arg1: memref<32x10xf32, #tpu.memory_space<vmem>>, %arg2: memref<4x128xf32, #tpu.memory_space<vmem>>, %arg3: memref<10x384xf32, #tpu.memory_space<vmem>>, %arg4: memref<1x384xf32, #tpu.memory_space<vmem>>, %arg5: memref<128x256xf32, #tpu.memory_space<vmem>>, %arg6: memref<128x128xf32, #tpu.memory_space<vmem>>, %arg7: memref<8x4x128xf32, #tpu.memory_space<vmem>>) attributes {dimension_semantics = [#tpu.dimension_semantics<arbitrary>], iteration_bounds = array<i64: 1>, scalar_prefetch = 0 : i64, scratch_operands = 0 : i64, tpu.core_type = #tpu.core_type<tc>, window_params = [{pipeline_mode = #tpu.pipeline_mode<synchronous>, transform_indices = @transform_0, window_bounds = array<i64: 32, 10>}, {pipeline_mode = #tpu.pipeline_mode<synchronous>, transform_indices = @transform_1, window_bounds = array<i64: 4, 128>}, {pipeline_mode = #tpu.pipeline_mode<synchronous>, transform_indices = @transform_2, window_bounds = array<i64: 10, 384>}, {pipeline_mode = #tpu.pipeline_mode<synchronous>, transform_indices = @transform_3, window_bounds = array<i64: 1, 384>}, {pipeline_mode = #tpu.pipeline_mode<synchronous>, transform_indices = @transform_4, window_bounds = array<i64: 128, 256>}, {pipeline_mode = #tpu.pipeline_mode<synchronous>, transform_indices = @transform_5, window_bounds = array<i64: 128, 128>}, {pipeline_mode = #tpu.pipeline_mode<synchronous>, transform_indices = @transform_6, window_bounds = array<i64: 8, 4, 128>}]} {
    %c0 = arith.constant 0 : index
    %c0_0 = arith.constant 0 : index
    %0 = vector.load %arg1[%c0, %c0_0] : memref<32x10xf32, #tpu.memory_space<vmem>>, vector<32x10xf32>
    %c0_1 = arith.constant 0 : index
    %c0_2 = arith.constant 0 : index
    %1 = vector.load %arg3[%c0_1, %c0_2] : memref<10x384xf32, #tpu.memory_space<vmem>>, vector<10x384xf32>
    %cst = arith.constant dense<0.000000e+00> : vector<32x384xf32>
    %2 = tpu.matmul %0, %1, %cst {dimension_numbers = #tpu.dot_dimension_numbers<[1], [0], [0], [1], [0, 0, 1, 1], [], []>} : vector<32x10xf32>, vector<10x384xf32>, vector<32x384xf32> -> vector<32x384xf32>
    %c0_3 = arith.constant 0 : index
    %c0_4 = arith.constant 0 : index
    %3 = vector.load %arg4[%c0_3, %c0_4] : memref<1x384xf32, #tpu.memory_space<vmem>>, vector<1x384xf32>
    %4 = vector.broadcast %3 : vector<1x384xf32> to vector<32x384xf32>
    %5 = arith.addf %2, %4 : vector<32x384xf32>
    %c0_5 = arith.constant 0 : index
    %c0_6 = arith.constant 0 : index
    %6 = vector.load %arg5[%c0_5, %c0_6] : memref<128x256xf32, #tpu.memory_space<vmem>>, vector<128x256xf32>
    %c0_7 = arith.constant 0 : index
    %c0_8 = arith.constant 0 : index
    %7 = vector.load %arg6[%c0_7, %c0_8] : memref<128x128xf32, #tpu.memory_space<vmem>>, vector<128x128xf32>
    %c0_9 = arith.constant 0 : index
    %c0_10 = arith.constant 0 : index
    %8 = vector.load %arg2[%c0_9, %c0_10] : memref<4x128xf32, #tpu.memory_space<vmem>>, vector<4x128xf32>
    %9 = vector.extract_strided_slice %5 {offsets = [0, 0], sizes = [4, 384], strides = [1, 1]} : vector<32x384xf32> to vector<4x384xf32>
    %10 = vector.extract_strided_slice %9 {offsets = [0, 0], sizes = [4, 256], strides = [1, 1]} : vector<4x384xf32> to vector<4x256xf32>
    %cst_11 = arith.constant dense<0.000000e+00> : vector<4x256xf32>
    %11 = tpu.matmul %8, %6, %cst_11 {dimension_numbers = #tpu.dot_dimension_numbers<[1], [0], [0], [1], [0, 0, 1, 1], [], []>} : vector<4x128xf32>, vector<128x256xf32>, vector<4x256xf32> -> vector<4x256xf32>
    %12 = arith.addf %10, %11 : vector<4x256xf32>
    %13 = arith.negf %12 : vector<4x256xf32>
    %14 = math.exp %13 : vector<4x256xf32>
    %cst_12 = arith.constant 1.000000e+00 : f32
    %15 = vector.broadcast %cst_12 : f32 to vector<4x256xf32>
    %16 = arith.addf %15, %14 : vector<4x256xf32>
    %17 = arith.divf %15, %16 : vector<4x256xf32>
    %18 = vector.extract_strided_slice %17 {offsets = [0, 0], sizes = [4, 128], strides = [1, 1]} : vector<4x256xf32> to vector<4x128xf32>
    %19 = vector.extract_strided_slice %17 {offsets = [0, 128], sizes = [4, 128], strides = [1, 1]} : vector<4x256xf32> to vector<4x128xf32>
    %20 = vector.extract_strided_slice %9 {offsets = [0, 256], sizes = [4, 128], strides = [1, 1]} : vector<4x384xf32> to vector<4x128xf32>
    %21 = arith.mulf %18, %8 : vector<4x128xf32>
    %cst_13 = arith.constant dense<0.000000e+00> : vector<4x128xf32>
    %22 = tpu.matmul %21, %7, %cst_13 {dimension_numbers = #tpu.dot_dimension_numbers<[1], [0], [0], [1], [0, 0, 1, 1], [], []>} : vector<4x128xf32>, vector<128x128xf32>, vector<4x128xf32> -> vector<4x128xf32>
    %23 = arith.addf %20, %22 : vector<4x128xf32>
    %24 = math.tanh %23 : vector<4x128xf32>
    %25 = arith.mulf %19, %8 : vector<4x128xf32>
    %cst_14 = arith.constant 1.000000e+00 : f32
    %26 = vector.broadcast %cst_14 : f32 to vector<4x128xf32>
    %27 = arith.subf %26, %19 : vector<4x128xf32>
    %28 = arith.mulf %27, %24 : vector<4x128xf32>
    %29 = arith.addf %25, %28 : vector<4x128xf32>
    %c0_15 = arith.constant 0 : index
    %c0_16 = arith.constant 0 : index
    %c0_17 = arith.constant 0 : index
    %30 = vector.load %arg7[%c0_15, %c0_16, %c0_17] : memref<8x4x128xf32, #tpu.memory_space<vmem>>, vector<1x4x128xf32>
    %31 = vector.shape_cast %30 : vector<1x4x128xf32> to vector<4x128xf32>
    %32 = vector.shape_cast %29 : vector<4x128xf32> to vector<1x4x128xf32>
    tpu.vector_store %arg7[%c0_15, %c0_16, %c0_17], %32 {strides = array<i32>} : memref<8x4x128xf32, #tpu.memory_space<vmem>>, vector<1x4x128xf32>,
    %33 = vector.extract_strided_slice %5 {offsets = [4, 0], sizes = [4, 384], strides = [1, 1]} : vector<32x384xf32> to vector<4x384xf32>
    %34 = vector.extract_strided_slice %33 {offsets = [0, 0], sizes = [4, 256], strides = [1, 1]} : vector<4x384xf32> to vector<4x256xf32>
    %cst_18 = arith.constant dense<0.000000e+00> : vector<4x256xf32>
    %35 = tpu.matmul %29, %6, %cst_18 {dimension_numbers = #tpu.dot_dimension_numbers<[1], [0], [0], [1], [0, 0, 1, 1], [], []>} : vector<4x128xf32>, vector<128x256xf32>, vector<4x256xf32> -> vector<4x256xf32>
    %36 = arith.addf %34, %35 : vector<4x256xf32>
    %37 = arith.negf %36 : vector<4x256xf32>
    %38 = math.exp %37 : vector<4x256xf32>
    %cst_19 = arith.constant 1.000000e+00 : f32
    %39 = vector.broadcast %cst_19 : f32 to vector<4x256xf32>
    %40 = arith.addf %39, %38 : vector<4x256xf32>
    %41 = arith.divf %39, %40 : vector<4x256xf32>
    %42 = vector.extract_strided_slice %41 {offsets = [0, 0], sizes = [4, 128], strides = [1, 1]} : vector<4x256xf32> to vector<4x128xf32>
    %43 = vector.extract_strided_slice %41 {offsets = [0, 128], sizes = [4, 128], strides = [1, 1]} : vector<4x256xf32> to vector<4x128xf32>
    %44 = vector.extract_strided_slice %33 {offsets = [0, 256], sizes = [4, 128], strides = [1, 1]} : vector<4x384xf32> to vector<4x128xf32>
    %45 = arith.mulf %42, %29 : vector<4x128xf32>
    %cst_20 = arith.constant dense<0.000000e+00> : vector<4x128xf32>
    %46 = tpu.matmul %45, %7, %cst_20 {dimension_numbers = #tpu.dot_dimension_numbers<[1], [0], [0], [1], [0, 0, 1, 1], [], []>} : vector<4x128xf32>, vector<128x128xf32>, vector<4x128xf32> -> vector<4x128xf32>
    %47 = arith.addf %44, %46 : vector<4x128xf32>
    %48 = math.tanh %47 : vector<4x128xf32>
    %49 = arith.mulf %43, %29 : vector<4x128xf32>
    %cst_21 = arith.constant 1.000000e+00 : f32
    %50 = vector.broadcast %cst_21 : f32 to vector<4x128xf32>
    %51 = arith.subf %50, %43 : vector<4x128xf32>
    %52 = arith.mulf %51, %48 : vector<4x128xf32>
    %53 = arith.addf %49, %52 : vector<4x128xf32>
    %c1 = arith.constant 1 : index
    %c0_22 = arith.constant 0 : index
    %c0_23 = arith.constant 0 : index
    %54 = vector.load %arg7[%c1, %c0_22, %c0_23] : memref<8x4x128xf32, #tpu.memory_space<vmem>>, vector<1x4x128xf32>
    %55 = vector.shape_cast %54 : vector<1x4x128xf32> to vector<4x128xf32>
    %56 = vector.shape_cast %53 : vector<4x128xf32> to vector<1x4x128xf32>
    tpu.vector_store %arg7[%c1, %c0_22, %c0_23], %56 {strides = array<i32>} : memref<8x4x128xf32, #tpu.memory_space<vmem>>, vector<1x4x128xf32>,
    %57 = vector.extract_strided_slice %5 {offsets = [8, 0], sizes = [4, 384], strides = [1, 1]} : vector<32x384xf32> to vector<4x384xf32>
    %58 = vector.extract_strided_slice %57 {offsets = [0, 0], sizes = [4, 256], strides = [1, 1]} : vector<4x384xf32> to vector<4x256xf32>
    %cst_24 = arith.constant dense<0.000000e+00> : vector<4x256xf32>
    %59 = tpu.matmul %53, %6, %cst_24 {dimension_numbers = #tpu.dot_dimension_numbers<[1], [0], [0], [1], [0, 0, 1, 1], [], []>} : vector<4x128xf32>, vector<128x256xf32>, vector<4x256xf32> -> vector<4x256xf32>
    %60 = arith.addf %58, %59 : vector<4x256xf32>
    %61 = arith.negf %60 : vector<4x256xf32>
    %62 = math.exp %61 : vector<4x256xf32>
    %cst_25 = arith.constant 1.000000e+00 : f32
    %63 = vector.broadcast %cst_25 : f32 to vector<4x256xf32>
    %64 = arith.addf %63, %62 : vector<4x256xf32>
    %65 = arith.divf %63, %64 : vector<4x256xf32>
    %66 = vector.extract_strided_slice %65 {offsets = [0, 0], sizes = [4, 128], strides = [1, 1]} : vector<4x256xf32> to vector<4x128xf32>
    %67 = vector.extract_strided_slice %65 {offsets = [0, 128], sizes = [4, 128], strides = [1, 1]} : vector<4x256xf32> to vector<4x128xf32>
    %68 = vector.extract_strided_slice %57 {offsets = [0, 256], sizes = [4, 128], strides = [1, 1]} : vector<4x384xf32> to vector<4x128xf32>
    %69 = arith.mulf %66, %53 : vector<4x128xf32>
    %cst_26 = arith.constant dense<0.000000e+00> : vector<4x128xf32>
    %70 = tpu.matmul %69, %7, %cst_26 {dimension_numbers = #tpu.dot_dimension_numbers<[1], [0], [0], [1], [0, 0, 1, 1], [], []>} : vector<4x128xf32>, vector<128x128xf32>, vector<4x128xf32> -> vector<4x128xf32>
    %71 = arith.addf %68, %70 : vector<4x128xf32>
    %72 = math.tanh %71 : vector<4x128xf32>
    %73 = arith.mulf %67, %53 : vector<4x128xf32>
    %cst_27 = arith.constant 1.000000e+00 : f32
    %74 = vector.broadcast %cst_27 : f32 to vector<4x128xf32>
    %75 = arith.subf %74, %67 : vector<4x128xf32>
    %76 = arith.mulf %75, %72 : vector<4x128xf32>
    %77 = arith.addf %73, %76 : vector<4x128xf32>
    %c2 = arith.constant 2 : index
    %c0_28 = arith.constant 0 : index
    %c0_29 = arith.constant 0 : index
    %78 = vector.load %arg7[%c2, %c0_28, %c0_29] : memref<8x4x128xf32, #tpu.memory_space<vmem>>, vector<1x4x128xf32>
    %79 = vector.shape_cast %78 : vector<1x4x128xf32> to vector<4x128xf32>
    %80 = vector.shape_cast %77 : vector<4x128xf32> to vector<1x4x128xf32>
    tpu.vector_store %arg7[%c2, %c0_28, %c0_29], %80 {strides = array<i32>} : memref<8x4x128xf32, #tpu.memory_space<vmem>>, vector<1x4x128xf32>,
    %81 = vector.extract_strided_slice %5 {offsets = [12, 0], sizes = [4, 384], strides = [1, 1]} : vector<32x384xf32> to vector<4x384xf32>
    %82 = vector.extract_strided_slice %81 {offsets = [0, 0], sizes = [4, 256], strides = [1, 1]} : vector<4x384xf32> to vector<4x256xf32>
    %cst_30 = arith.constant dense<0.000000e+00> : vector<4x256xf32>
    %83 = tpu.matmul %77, %6, %cst_30 {dimension_numbers = #tpu.dot_dimension_numbers<[1], [0], [0], [1], [0, 0, 1, 1], [], []>} : vector<4x128xf32>, vector<128x256xf32>, vector<4x256xf32> -> vector<4x256xf32>
    %84 = arith.addf %82, %83 : vector<4x256xf32>
    %85 = arith.negf %84 : vector<4x256xf32>
    %86 = math.exp %85 : vector<4x256xf32>
    %cst_31 = arith.constant 1.000000e+00 : f32
    %87 = vector.broadcast %cst_31 : f32 to vector<4x256xf32>
    %88 = arith.addf %87, %86 : vector<4x256xf32>
    %89 = arith.divf %87, %88 : vector<4x256xf32>
    %90 = vector.extract_strided_slice %89 {offsets = [0, 0], sizes = [4, 128], strides = [1, 1]} : vector<4x256xf32> to vector<4x128xf32>
    %91 = vector.extract_strided_slice %89 {offsets = [0, 128], sizes = [4, 128], strides = [1, 1]} : vector<4x256xf32> to vector<4x128xf32>
    %92 = vector.extract_strided_slice %81 {offsets = [0, 256], sizes = [4, 128], strides = [1, 1]} : vector<4x384xf32> to vector<4x128xf32>
    %93 = arith.mulf %90, %77 : vector<4x128xf32>
    %cst_32 = arith.constant dense<0.000000e+00> : vector<4x128xf32>
    %94 = tpu.matmul %93, %7, %cst_32 {dimension_numbers = #tpu.dot_dimension_numbers<[1], [0], [0], [1], [0, 0, 1, 1], [], []>} : vector<4x128xf32>, vector<128x128xf32>, vector<4x128xf32> -> vector<4x128xf32>
    %95 = arith.addf %92, %94 : vector<4x128xf32>
    %96 = math.tanh %95 : vector<4x128xf32>
    %97 = arith.mulf %91, %77 : vector<4x128xf32>
    %cst_33 = arith.constant 1.000000e+00 : f32
    %98 = vector.broadcast %cst_33 : f32 to vector<4x128xf32>
    %99 = arith.subf %98, %91 : vector<4x128xf32>
    %100 = arith.mulf %99, %96 : vector<4x128xf32>
    %101 = arith.addf %97, %100 : vector<4x128xf32>
    %c3 = arith.constant 3 : index
    %c0_34 = arith.constant 0 : index
    %c0_35 = arith.constant 0 : index
    %102 = vector.load %arg7[%c3, %c0_34, %c0_35] : memref<8x4x128xf32, #tpu.memory_space<vmem>>, vector<1x4x128xf32>
    %103 = vector.shape_cast %102 : vector<1x4x128xf32> to vector<4x128xf32>
    %104 = vector.shape_cast %101 : vector<4x128xf32> to vector<1x4x128xf32>
    tpu.vector_store %arg7[%c3, %c0_34, %c0_35], %104 {strides = array<i32>} : memref<8x4x128xf32, #tpu.memory_space<vmem>>, vector<1x4x128xf32>,
    %105 = vector.extract_strided_slice %5 {offsets = [16, 0], sizes = [4, 384], strides = [1, 1]} : vector<32x384xf32> to vector<4x384xf32>
    %106 = vector.extract_strided_slice %105 {offsets = [0, 0], sizes = [4, 256], strides = [1, 1]} : vector<4x384xf32> to vector<4x256xf32>
    %cst_36 = arith.constant dense<0.000000e+00> : vector<4x256xf32>
    %107 = tpu.matmul %101, %6, %cst_36 {dimension_numbers = #tpu.dot_dimension_numbers<[1], [0], [0], [1], [0, 0, 1, 1], [], []>} : vector<4x128xf32>, vector<128x256xf32>, vector<4x256xf32> -> vector<4x256xf32>
    %108 = arith.addf %106, %107 : vector<4x256xf32>
    %109 = arith.negf %108 : vector<4x256xf32>
    %110 = math.exp %109 : vector<4x256xf32>
    %cst_37 = arith.constant 1.000000e+00 : f32
    %111 = vector.broadcast %cst_37 : f32 to vector<4x256xf32>
    %112 = arith.addf %111, %110 : vector<4x256xf32>
    %113 = arith.divf %111, %112 : vector<4x256xf32>
    %114 = vector.extract_strided_slice %113 {offsets = [0, 0], sizes = [4, 128], strides = [1, 1]} : vector<4x256xf32> to vector<4x128xf32>
    %115 = vector.extract_strided_slice %113 {offsets = [0, 128], sizes = [4, 128], strides = [1, 1]} : vector<4x256xf32> to vector<4x128xf32>
    %116 = vector.extract_strided_slice %105 {offsets = [0, 256], sizes = [4, 128], strides = [1, 1]} : vector<4x384xf32> to vector<4x128xf32>
    %117 = arith.mulf %114, %101 : vector<4x128xf32>
    %cst_38 = arith.constant dense<0.000000e+00> : vector<4x128xf32>
    %118 = tpu.matmul %117, %7, %cst_38 {dimension_numbers = #tpu.dot_dimension_numbers<[1], [0], [0], [1], [0, 0, 1, 1], [], []>} : vector<4x128xf32>, vector<128x128xf32>, vector<4x128xf32> -> vector<4x128xf32>
    %119 = arith.addf %116, %118 : vector<4x128xf32>
    %120 = math.tanh %119 : vector<4x128xf32>
    %121 = arith.mulf %115, %101 : vector<4x128xf32>
    %cst_39 = arith.constant 1.000000e+00 : f32
    %122 = vector.broadcast %cst_39 : f32 to vector<4x128xf32>
    %123 = arith.subf %122, %115 : vector<4x128xf32>
    %124 = arith.mulf %123, %120 : vector<4x128xf32>
    %125 = arith.addf %121, %124 : vector<4x128xf32>
    %c4 = arith.constant 4 : index
    %c0_40 = arith.constant 0 : index
    %c0_41 = arith.constant 0 : index
    %126 = vector.load %arg7[%c4, %c0_40, %c0_41] : memref<8x4x128xf32, #tpu.memory_space<vmem>>, vector<1x4x128xf32>
    %127 = vector.shape_cast %126 : vector<1x4x128xf32> to vector<4x128xf32>
    %128 = vector.shape_cast %125 : vector<4x128xf32> to vector<1x4x128xf32>
    tpu.vector_store %arg7[%c4, %c0_40, %c0_41], %128 {strides = array<i32>} : memref<8x4x128xf32, #tpu.memory_space<vmem>>, vector<1x4x128xf32>,
    %129 = vector.extract_strided_slice %5 {offsets = [20, 0], sizes = [4, 384], strides = [1, 1]} : vector<32x384xf32> to vector<4x384xf32>
    %130 = vector.extract_strided_slice %129 {offsets = [0, 0], sizes = [4, 256], strides = [1, 1]} : vector<4x384xf32> to vector<4x256xf32>
    %cst_42 = arith.constant dense<0.000000e+00> : vector<4x256xf32>
    %131 = tpu.matmul %125, %6, %cst_42 {dimension_numbers = #tpu.dot_dimension_numbers<[1], [0], [0], [1], [0, 0, 1, 1], [], []>} : vector<4x128xf32>, vector<128x256xf32>, vector<4x256xf32> -> vector<4x256xf32>
    %132 = arith.addf %130, %131 : vector<4x256xf32>
    %133 = arith.negf %132 : vector<4x256xf32>
    %134 = math.exp %133 : vector<4x256xf32>
    %cst_43 = arith.constant 1.000000e+00 : f32
    %135 = vector.broadcast %cst_43 : f32 to vector<4x256xf32>
    %136 = arith.addf %135, %134 : vector<4x256xf32>
    %137 = arith.divf %135, %136 : vector<4x256xf32>
    %138 = vector.extract_strided_slice %137 {offsets = [0, 0], sizes = [4, 128], strides = [1, 1]} : vector<4x256xf32> to vector<4x128xf32>
    %139 = vector.extract_strided_slice %137 {offsets = [0, 128], sizes = [4, 128], strides = [1, 1]} : vector<4x256xf32> to vector<4x128xf32>
    %140 = vector.extract_strided_slice %129 {offsets = [0, 256], sizes = [4, 128], strides = [1, 1]} : vector<4x384xf32> to vector<4x128xf32>
    %141 = arith.mulf %138, %125 : vector<4x128xf32>
    %cst_44 = arith.constant dense<0.000000e+00> : vector<4x128xf32>
    %142 = tpu.matmul %141, %7, %cst_44 {dimension_numbers = #tpu.dot_dimension_numbers<[1], [0], [0], [1], [0, 0, 1, 1], [], []>} : vector<4x128xf32>, vector<128x128xf32>, vector<4x128xf32> -> vector<4x128xf32>
    %143 = arith.addf %140, %142 : vector<4x128xf32>
    %144 = math.tanh %143 : vector<4x128xf32>
    %145 = arith.mulf %139, %125 : vector<4x128xf32>
    %cst_45 = arith.constant 1.000000e+00 : f32
    %146 = vector.broadcast %cst_45 : f32 to vector<4x128xf32>
    %147 = arith.subf %146, %139 : vector<4x128xf32>
    %148 = arith.mulf %147, %144 : vector<4x128xf32>
    %149 = arith.addf %145, %148 : vector<4x128xf32>
    %c5 = arith.constant 5 : index
    %c0_46 = arith.constant 0 : index
    %c0_47 = arith.constant 0 : index
    %150 = vector.load %arg7[%c5, %c0_46, %c0_47] : memref<8x4x128xf32, #tpu.memory_space<vmem>>, vector<1x4x128xf32>
    %151 = vector.shape_cast %150 : vector<1x4x128xf32> to vector<4x128xf32>
    %152 = vector.shape_cast %149 : vector<4x128xf32> to vector<1x4x128xf32>
    tpu.vector_store %arg7[%c5, %c0_46, %c0_47], %152 {strides = array<i32>} : memref<8x4x128xf32, #tpu.memory_space<vmem>>, vector<1x4x128xf32>,
    %153 = vector.extract_strided_slice %5 {offsets = [24, 0], sizes = [4, 384], strides = [1, 1]} : vector<32x384xf32> to vector<4x384xf32>
    %154 = vector.extract_strided_slice %153 {offsets = [0, 0], sizes = [4, 256], strides = [1, 1]} : vector<4x384xf32> to vector<4x256xf32>
    %cst_48 = arith.constant dense<0.000000e+00> : vector<4x256xf32>
    %155 = tpu.matmul %149, %6, %cst_48 {dimension_numbers = #tpu.dot_dimension_numbers<[1], [0], [0], [1], [0, 0, 1, 1], [], []>} : vector<4x128xf32>, vector<128x256xf32>, vector<4x256xf32> -> vector<4x256xf32>
    %156 = arith.addf %154, %155 : vector<4x256xf32>
    %157 = arith.negf %156 : vector<4x256xf32>
    %158 = math.exp %157 : vector<4x256xf32>
    %cst_49 = arith.constant 1.000000e+00 : f32
    %159 = vector.broadcast %cst_49 : f32 to vector<4x256xf32>
    %160 = arith.addf %159, %158 : vector<4x256xf32>
    %161 = arith.divf %159, %160 : vector<4x256xf32>
    %162 = vector.extract_strided_slice %161 {offsets = [0, 0], sizes = [4, 128], strides = [1, 1]} : vector<4x256xf32> to vector<4x128xf32>
    %163 = vector.extract_strided_slice %161 {offsets = [0, 128], sizes = [4, 128], strides = [1, 1]} : vector<4x256xf32> to vector<4x128xf32>
    %164 = vector.extract_strided_slice %153 {offsets = [0, 256], sizes = [4, 128], strides = [1, 1]} : vector<4x384xf32> to vector<4x128xf32>
    %165 = arith.mulf %162, %149 : vector<4x128xf32>
    %cst_50 = arith.constant dense<0.000000e+00> : vector<4x128xf32>
    %166 = tpu.matmul %165, %7, %cst_50 {dimension_numbers = #tpu.dot_dimension_numbers<[1], [0], [0], [1], [0, 0, 1, 1], [], []>} : vector<4x128xf32>, vector<128x128xf32>, vector<4x128xf32> -> vector<4x128xf32>
    %167 = arith.addf %164, %166 : vector<4x128xf32>
    %168 = math.tanh %167 : vector<4x128xf32>
    %169 = arith.mulf %163, %149 : vector<4x128xf32>
    %cst_51 = arith.constant 1.000000e+00 : f32
    %170 = vector.broadcast %cst_51 : f32 to vector<4x128xf32>
    %171 = arith.subf %170, %163 : vector<4x128xf32>
    %172 = arith.mulf %171, %168 : vector<4x128xf32>
    %173 = arith.addf %169, %172 : vector<4x128xf32>
    %c6 = arith.constant 6 : index
    %c0_52 = arith.constant 0 : index
    %c0_53 = arith.constant 0 : index
    %174 = vector.load %arg7[%c6, %c0_52, %c0_53] : memref<8x4x128xf32, #tpu.memory_space<vmem>>, vector<1x4x128xf32>
    %175 = vector.shape_cast %174 : vector<1x4x128xf32> to vector<4x128xf32>
    %176 = vector.shape_cast %173 : vector<4x128xf32> to vector<1x4x128xf32>
    tpu.vector_store %arg7[%c6, %c0_52, %c0_53], %176 {strides = array<i32>} : memref<8x4x128xf32, #tpu.memory_space<vmem>>, vector<1x4x128xf32>,
    %177 = vector.extract_strided_slice %5 {offsets = [28, 0], sizes = [4, 384], strides = [1, 1]} : vector<32x384xf32> to vector<4x384xf32>
    %178 = vector.extract_strided_slice %177 {offsets = [0, 0], sizes = [4, 256], strides = [1, 1]} : vector<4x384xf32> to vector<4x256xf32>
    %cst_54 = arith.constant dense<0.000000e+00> : vector<4x256xf32>
    %179 = tpu.matmul %173, %6, %cst_54 {dimension_numbers = #tpu.dot_dimension_numbers<[1], [0], [0], [1], [0, 0, 1, 1], [], []>} : vector<4x128xf32>, vector<128x256xf32>, vector<4x256xf32> -> vector<4x256xf32>
    %180 = arith.addf %178, %179 : vector<4x256xf32>
    %181 = arith.negf %180 : vector<4x256xf32>
    %182 = math.exp %181 : vector<4x256xf32>
    %cst_55 = arith.constant 1.000000e+00 : f32
    %183 = vector.broadcast %cst_55 : f32 to vector<4x256xf32>
    %184 = arith.addf %183, %182 : vector<4x256xf32>
    %185 = arith.divf %183, %184 : vector<4x256xf32>
    %186 = vector.extract_strided_slice %185 {offsets = [0, 0], sizes = [4, 128], strides = [1, 1]} : vector<4x256xf32> to vector<4x128xf32>
    %187 = vector.extract_strided_slice %185 {offsets = [0, 128], sizes = [4, 128], strides = [1, 1]} : vector<4x256xf32> to vector<4x128xf32>
    %188 = vector.extract_strided_slice %177 {offsets = [0, 256], sizes = [4, 128], strides = [1, 1]} : vector<4x384xf32> to vector<4x128xf32>
    %189 = arith.mulf %186, %173 : vector<4x128xf32>
    %cst_56 = arith.constant dense<0.000000e+00> : vector<4x128xf32>
    %190 = tpu.matmul %189, %7, %cst_56 {dimension_numbers = #tpu.dot_dimension_numbers<[1], [0], [0], [1], [0, 0, 1, 1], [], []>} : vector<4x128xf32>, vector<128x128xf32>, vector<4x128xf32> -> vector<4x128xf32>
    %191 = arith.addf %188, %190 : vector<4x128xf32>
    %192 = math.tanh %191 : vector<4x128xf32>
    %193 = arith.mulf %187, %173 : vector<4x128xf32>
    %cst_57 = arith.constant 1.000000e+00 : f32
    %194 = vector.broadcast %cst_57 : f32 to vector<4x128xf32>
    %195 = arith.subf %194, %187 : vector<4x128xf32>
    %196 = arith.mulf %195, %192 : vector<4x128xf32>
    %197 = arith.addf %193, %196 : vector<4x128xf32>
    %c7 = arith.constant 7 : index
    %c0_58 = arith.constant 0 : index
    %c0_59 = arith.constant 0 : index
    %198 = vector.load %arg7[%c7, %c0_58, %c0_59] : memref<8x4x128xf32, #tpu.memory_space<vmem>>, vector<1x4x128xf32>
    %199 = vector.shape_cast %198 : vector<1x4x128xf32> to vector<4x128xf32>
    %200 = vector.shape_cast %197 : vector<4x128xf32> to vector<1x4x128xf32>
    tpu.vector_store %arg7[%c7, %c0_58, %c0_59], %200 {strides = array<i32>} : memref<8x4x128xf32, #tpu.memory_space<vmem>>, vector<1x4x128xf32>,
    return
  }
  func.func @transform_0(%arg0: i32) -> (i32, i32) {
    %c0_i32 = arith.constant 0 : i32
    %c0_i32_0 = arith.constant 0 : i32
    %c0_i32_1 = arith.constant 0 : i32
    return %c0_i32, %c0_i32_0 : i32, i32
  }
  func.func @transform_1(%arg0: i32) -> (i32, i32) {
    %c0_i32 = arith.constant 0 : i32
    %c0_i32_0 = arith.constant 0 : i32
    %c0_i32_1 = arith.constant 0 : i32
    return %c0_i32, %c0_i32_0 : i32, i32
  }
  func.func @transform_2(%arg0: i32) -> (i32, i32) {
    %c0_i32 = arith.constant 0 : i32
    %c0_i32_0 = arith.constant 0 : i32
    %c0_i32_1 = arith.constant 0 : i32
    return %c0_i32, %c0_i32_0 : i32, i32
  }
  func.func @transform_3(%arg0: i32) -> (i32, i32) {
    %c0_i32 = arith.constant 0 : i32
    %c0_i32_0 = arith.constant 0 : i32
    %c0_i32_1 = arith.constant 0 : i32
    return %c0_i32, %c0_i32_0 : i32, i32
  }
  func.func @transform_4(%arg0: i32) -> (i32, i32) {
    %c0_i32 = arith.constant 0 : i32
    %c0_i32_0 = arith.constant 0 : i32
    %c0_i32_1 = arith.constant 0 : i32
    return %c0_i32, %c0_i32_0 : i32, i32
  }
  func.func @transform_5(%arg0: i32) -> (i32, i32) {
    %c0_i32 = arith.constant 0 : i32
    %c0_i32_0 = arith.constant 0 : i32
    %c0_i32_1 = arith.constant 0 : i32
    return %c0_i32, %c0_i32_0 : i32, i32
  }
  func.func @transform_6(%arg0: i32) -> (i32, i32, i32) {
    %c0_i32 = arith.constant 0 : i32
    %c0_i32_0 = arith.constant 0 : i32
    %c0_i32_1 = arith.constant 0 : i32
    %c0_i32_2 = arith.constant 0 : i32
    return %c0_i32, %c0_i32_0, %c0_i32_1 : i32, i32, i32
  }
}

</mosaic_0001>

<bundles_post_ra>
// kernel: gru_encoder_sequence.1
= control target key start
LH: loop header
LB: loop body
LE: loop exit
PB: predicated region body
PF: predicated region fallthrough
CT: control target
= control target key end

     0   :  { %11 = vsyncpa [#allocation3], 0  ;;  %s3398_s0 = inlined_call_operand.hbm [shape: f32[32,10], index: 0, kind: input, shape index: {}]   ;;  %s3399_s1 = inlined_call_operand.vmem [shape: f32[4,128], index: 1, kind: input, shape index: {}]   ;;  %s3400_s2 = inlined_call_operand.hbm [shape: f32[10,384], index: 2, kind: input, shape index: {}]   ;;  %s3401_s3 = inlined_call_operand.vmem [shape: f32[1,384], index: 3, kind: input, shape index: {}]   ;;  %s3402_s4 = inlined_call_operand.hbm [shape: f32[128,256], index: 4, kind: input, shape index: {}]   ;;  %s3403_s5 = inlined_call_operand.hbm [shape: f32[128,128], index: 5, kind: input, shape index: {}]   ;;  %s3404_s6 = inlined_call_operand.vmem [shape: f32[8,4,128], index: 6, kind: output, shape index: {}]  }
   0x1   :  { %12 = vsyncpa [#allocation5], 0 }
   0x2   :  { %13 = vsyncpa [#allocation8], 0  ;;  %s2852_s21 = smov [#allocation4]   ;;  %s2758_s25 = scalar_lea.hbm %s3400_s2, 768 }
   0x3   :  { %s33_s22 = sshll.u32 %s2852_s21, 4  ;;  %p2759_p0 = scmp.ne.s32.totalorder %s3400_s2, %s2758_s25  ;;  %s34_s22 = int_to_ptr.vmem [resolvable:$true] %s33_s22 }
   0x4   :  { %p2762_p1 = scmp.lt.u32.totalorder %s2758_s25, %s3400_s2 }
   0x6   :  { %p2764_p2 = pnand %p2762_p1, %p2759_p0 }
   0x8   :  { %2767 = shalt.err (!%p2764_p2)
}
   0x9   :  { %s2768_s30 = scalar_lea.vmem %s34_s22, 768  ;;  %p2773_p4 = scmp.lt.s32.totalorder %s34_s22, %s34_s22 }
   0xa   :  { %p2769_p3 = scmp.ne.s32.totalorder %s34_s22, %s2768_s30  ;;  %p2774_p5 = scmp.lt.s32.totalorder %s2768_s30, %s2768_s30 }
   0xc   :  { %p2775_p6 = por %p2774_p5, %p2773_p4 }
   0xe   :  { %p2776_p7 = pnand %p2775_p6, %p2769_p3 }
  0x10   :  { %2779 = shalt.err (!%p2776_p7)
}
  0x11   :  { %s2853_s7 = smov 384   ;;  %s2854_s8 = smov 24  }
  0x12   :  { %39 = dma.hbm_to_vmem [thread:$0]  %s3400_s2, 768, %s34_s22, [#allocation5], %s2853_s7, %s2853_s7, %s2854_s8  }
  0x13   :  { %s2855_s11 = smov [#allocation2]   ;;  %s2780_s15 = scalar_lea.hbm %s3398_s0, 512 }
  0x14   :  { %s19_s12 = sshll.u32 %s2855_s11, 4  ;;  %p2781_p8 = scmp.ne.s32.totalorder %s3398_s0, %s2780_s15  ;;  %s20_s12 = int_to_ptr.vmem [resolvable:$true] %s19_s12 }
  0x15   :  { %p2784_p9 = scmp.lt.u32.totalorder %s2780_s15, %s3398_s0 }
  0x17   :  { %p2786_p10 = pnand %p2784_p9, %p2781_p8 }
  0x19   :  { %2789 = shalt.err (!%p2786_p10)
}
  0x1a   :  { %s2790_s20 = scalar_lea.vmem %s20_s12, 512  ;;  %p2795_p12 = scmp.lt.s32.totalorder %s20_s12, %s20_s12 }
  0x1b   :  { %p2791_p11 = scmp.ne.s32.totalorder %s20_s12, %s2790_s20  ;;  %p2796_p13 = scmp.lt.s32.totalorder %s2790_s20, %s2790_s20 }
  0x1d   :  { %p2797_p0 = por %p2796_p13, %p2795_p12 }
  0x1f   :  { %p2798_p1 = pnand %p2797_p0, %p2791_p11 }
  0x21   :  { %2801 = shalt.err (!%p2798_p1)
}
  0x22   :  { %s2856_s2 = smov 128   ;;  %s2857_s21 = smov 8  }
  0x23   :  { %25 = dma.hbm_to_vmem [thread:$0]  %s3398_s0, 512, %s20_s12, [#allocation3], %s2856_s2, %s2856_s2, %s2857_s21  }
  0x24   :  { %s2858_s24 = smov [#allocation6]   ;;  %s2802_s28 = scalar_lea.hbm %s3402_s4, 4096 }
  0x25   :  { %s47_s25 = sshll.u32 %s2858_s24, 4  ;;  %p2803_p2 = scmp.ne.s32.totalorder %s3402_s4, %s2802_s28  ;;  %s48_s25 = int_to_ptr.vmem [resolvable:$true] %s47_s25 }
  0x26   :  { %p2806_p3 = scmp.lt.u32.totalorder %s2802_s28, %s3402_s4 }
  0x28   :  { %p2808_p4 = pnand %p2806_p3, %p2803_p2 }
  0x2a   :  { %2811 = shalt.err (!%p2808_p4)
}
  0x2b   :  { %s2812_s9 = scalar_lea.vmem %s48_s25, 4096  ;;  %p2817_p6 = scmp.lt.s32.totalorder %s48_s25, %s48_s25 }
  0x2c   :  { %p2813_p5 = scmp.ne.s32.totalorder %s48_s25, %s2812_s9  ;;  %p2818_p7 = scmp.lt.s32.totalorder %s2812_s9, %s2812_s9 }
  0x2e   :  { %p2819_p8 = por %p2818_p7, %p2817_p6 }
  0x30   :  { %p2820_p9 = pnand %p2819_p8, %p2813_p5 }
  0x32   :  { %2823 = shalt.err (!%p2820_p9)
}
  0x33   :  { %s2859_s0 = smov 256   ;;  %s2860_s10 = smov 16  }
  0x34   :  { %53 = dma.hbm_to_vmem [thread:$0]  %s3402_s4, 4096, %s48_s25, [#allocation5], %s2859_s0, %s2859_s0, %s2860_s10  }
  0x35   :  { %s2861_s13 = smov [#allocation7]   ;;  %s2824_s17 = scalar_lea.hbm %s3403_s5, 2048 }
  0x36   :  { %s59_s14 = sshll.u32 %s2861_s13, 4  ;;  %p2825_p10 = scmp.ne.s32.totalorder %s3403_s5, %s2824_s17  ;;  %s60_s14 = int_to_ptr.vmem [resolvable:$true] %s59_s14 }
  0x37   :  { %p2828_p11 = scmp.lt.u32.totalorder %s2824_s17, %s3403_s5 }
  0x39   :  { %p2830_p12 = pnand %p2828_p11, %p2825_p10 }
  0x3b   :  { %2833 = shalt.err (!%p2830_p12)
}
  0x3c   :  { %s2834_s23 = scalar_lea.vmem %s60_s14, 2048  ;;  %p2839_p0 = scmp.lt.s32.totalorder %s60_s14, %s60_s14 }
  0x3d   :  { %p2835_p13 = scmp.ne.s32.totalorder %s60_s14, %s2834_s23  ;;  %p2840_p1 = scmp.lt.s32.totalorder %s2834_s23, %s2834_s23 }
  0x3f   :  { %p2841_p2 = por %p2840_p1, %p2839_p0 }
  0x41   :  { %p2842_p3 = pnand %p2841_p2, %p2835_p13 }
  0x43   :  { %2845 = shalt.err (!%p2842_p3)
}
  0x44   :  { %65 = dma.hbm_to_vmem [thread:$0]  %s3403_s5, 2048, %s60_s14, [#allocation8], %s2856_s2, %s2856_s2, %s2857_s21  }
  0x45   :  { %2846 = dma.done.wait [#allocation3], 512  }
  0x46   :  { %2847 = vsyncadd [#allocation3], 4294966784 }
  0x47   :  { %2848 = dma.done.wait [#allocation5], 4864  }
  0x48   :  { %2849 = vsyncadd [#allocation5], 4294962432 }
  0x49   :  { %2850 = dma.done.wait [#allocation8], 2048  }
  0x4a   :  { %2851 = vsyncadd [#allocation8], 4294965248  ;;  %v2862_v0 = vmov 0.0   ;;  %vm118_vm0 = vcmask 1041408   ;;  %vm2863_vm1 = vmmov 1   ;;  %v83_v2 = vld [vmem:[#allocation4 + $0x8] sm:$0xff] }
  0x4b   :  { %192 = vmatprep.mubr.f32.mxu0 %v2862_v0  ;;  %vm2956_vm2 = vmpackc.low %vm118_vm0, %vm2863_vm1  ;;  %v86_v3 = vld [vmem:[#allocation4 + $0x20] sm:$0x3]  ;;  %v85_v6 = vld [vmem:[#allocation4 + $0x18] sm:$0x3]  ;;  %vm105_vm3 = vcmask 80896   ;;  %vm2865_vm4 = vmmov 0  }
  0x4c   :  { %v82_v4 = vld [vmem:[#allocation4] sm:$0xff]  ;;  %v2204_v5 = vpack.c.bf16 %v86_v3, %v83_v2  ;;  %v303_v8 = vld [vmem:[#allocation6 + $0x8] sm:$0xff]  ;;  %v305_v10 = vld [vmem:[#allocation6 + $0x18] sm:$0xff]  ;;  %v2864_v2 = vmov 0.0|0.0  }
  0x4d   :  { %v78_v7 = vld [vmem:[#allocation2] sm:$0xff]  ;;  %v2207_v9 = vpack.c.bf16 %v85_v6, %v82_v4  ;;  %v302_v11 = vld [vmem:[#allocation6] sm:$0xff]  ;;  %v2963_v13 = vpack.c.bf16 %v305_v10, %v303_v8  ;;  %v307_v14 = vld [vmem:[#allocation6 + $0x28] sm:$0xff] }
  0x4e   :  { %v304_v12 = vld [vmem:[#allocation6 + $0x10] sm:$0xff]  ;;  %1918 = vmatprep.mubr.msk.f32.mxu1 %vm105_vm3, %v78_v7  ;;  %2206 = vmatprep.subr.msk.bf16.mxu0 %vm2956_vm2, %v2204_v5  ;;  %v309_v15 = vld [vmem:[#allocation6 + $0x38] sm:$0xff]  ;;  %v306_v18 = vld [vmem:[#allocation6 + $0x20] sm:$0xff] }
  0x4f   :  { %2209 = vmatpush1.bf16.msk.msra.mxu0 %vm2956_vm2, %v2207_v9  ;;  %v2967_v16 = vpack.c.bf16 %v304_v12, %v302_v11  ;;  %v2970_v17 = vpack.c.bf16 %v309_v15, %v307_v14  ;;  %v308_v19 = vld [vmem:[#allocation6 + $0x30] sm:$0xff]  ;;  %v311_v20 = vld [vmem:[#allocation6 + $0x48] sm:$0xff]  ;;  %v313_v21 = vld [vmem:[#allocation6 + $0x58] sm:$0xff] }
  0x50   :  { %2217 = vmatprep.subr.bf16.mxu0 %v2963_v13  ;;  %v2974_v22 = vpack.c.bf16 %v308_v19, %v306_v18  ;;  %v2977_v23 = vld [vmem:[#allocation2 + $0x8] sm:$0xff]  ;;  %v2980_v24 = vpack.c.bf16 %v313_v21, %v311_v20  ;;  %v310_v25 = vld [vmem:[#allocation6 + $0x40] sm:$0xff]  ;;  %v312_v26 = vld [vmem:[#allocation6 + $0x50] sm:$0xff] }
  0x51   :  { %v315_v27 = vld [vmem:[#allocation6 + $0x68] sm:$0xff]  ;;  %v317_v28 = vld [vmem:[#allocation6 + $0x78] sm:$0xff]  ;;  %v2985_v29 = vpack.c.bf16 %v312_v26, %v310_v25  ;;  %v2988_v30 = vld [vmem:[#allocation2 + $0x10] sm:$0xff] }
  0x52   :  { %1740 = vmatmul.mubr.msk.f32.vlgmr.msra.gmra.mrb[0].mxu0 %vm105_vm3, %v78_v7  ;;  %v2991_v31 = vpack.c.bf16 %v317_v28, %v315_v27  ;;  %v314_v32 = vld [vmem:[#allocation6 + $0x60] sm:$0xff]  ;;  %v316_v33 = vld [vmem:[#allocation6 + $0x70] sm:$0xff]  ;;  %v319_v34 = vld [vmem:[#allocation6 + $0x88] sm:$0xff] }
  0x53   :  { %2219 = vmatpush1.bf16.msra.mxu0 %v2967_v16  ;;  %198 = vmatprep.mubr.f32.mxu0 %v2862_v0  ;;  %v321_v35 = vld [vmem:[#allocation6 + $0x98] sm:$0xff]  ;;  %v2996_v36 = vpack.c.bf16 %v316_v33, %v314_v32  ;;  %v2999_v37 = vld [vmem:[#allocation2 + $0x18] sm:$0xff]  ;;  %v318_v39 = vld [vmem:[#allocation6 + $0x80] sm:$0xff]  ;;  %v90_v33 = vlaneseq }
  0x54   :  { %2221 = vmatprep.subr.bf16.mxu0 %v2970_v17  ;;  %v3002_v38 = vpack.c.bf16 %v321_v35, %v319_v34  ;;  %v320_v40 = vld [vmem:[#allocation6 + $0x90] sm:$0xff]  ;;  %v323_v41 = vld [vmem:[#allocation6 + $0xa8] sm:$0xff]  ;;  %v325_v42 = vld [vmem:[#allocation6 + $0xb8] sm:$0xff] }
  0x55   :  { %v3007_v43 = vpack.c.bf16 %v320_v40, %v318_v39  ;;  %v3011_v44 = vpack.c.bf16 %v325_v42, %v323_v41  ;;  %v322_v45 = vld [vmem:[#allocation6 + $0xa0] sm:$0xff]  ;;  %v324_v46 = vld [vmem:[#allocation6 + $0xb0] sm:$0xff]  ;;  %v327_v47 = vld [vmem:[#allocation6 + $0xc8] sm:$0xff]  ;;  %v91_v34 = vshrl.u32 %v90_v33, 7 }
  0x56   :  { %1741 = vmatmul.mubr.msk.f32.gmra.mrb[2].mxu0 %vm105_vm3, %v2977_v23  ;;  %v329_v48 = vld [vmem:[#allocation6 + $0xd8] sm:$0xff]  ;;  %v3014_v49 = vpack.c.bf16 %v324_v46, %v322_v45  ;;  %v326_v51 = vld [vmem:[#allocation6 + $0xc0] sm:$0xff]  ;;  %v328_v52 = vld [vmem:[#allocation6 + $0xd0] sm:$0xff] }
  0x57   :  { %2223 = vmatpush1.bf16.msra.mxu0 %v2974_v22  ;;  %204 = vmatprep.mubr.f32.mxu0 %v2862_v0  ;;  %v3017_v50 = vpack.c.bf16 %v329_v48, %v327_v47  ;;  %v331_v53 = vld [vmem:[#allocation6 + $0xe8] sm:$0xff]  ;;  %v333_v54 = vld [vmem:[#allocation6 + $0xf8] sm:$0xff]  ;;  %v3020_v55 = vpack.c.bf16 %v328_v52, %v326_v51  ;;  %v330_v57 = vld [vmem:[#allocation6 + $0xe0] sm:$0xff]  ;;  %v92_v35 = vsub.s32 0, %v91_v34  ;;  %v96_v40 = vsub.s32 1, %v91_v34 }
  0x58   :  { %2225 = vmatprep.subr.bf16.mxu0 %v2980_v24  ;;  %v3023_v56 = vpack.c.bf16 %v333_v54, %v331_v53  ;;  %v332_v58 = vld [vmem:[#allocation6 + $0xf0] sm:$0xff]  ;;  %v84_v61 = vld [vmem:[#allocation4 + $0x10] sm:$0xff]  ;;  %v87_v62 = vld [vmem:[#allocation4 + $0x28] sm:$0x3] }
  0x59   :  { %v3026_v59 = vpack.c.bf16 %v332_v58, %v330_v57  ;;  %v3033_v60 = vld [vmem:[%s3399_s1] sm:$0xf]  ;;  %v2210_v63 = vpack.c.bf16 %v87_v62, %v84_v61  ;;  %v334_v3 = vld [vmem:[#allocation7] sm:$0xff]  ;;  %v335_v4 = vld [vmem:[#allocation7 + $0x8] sm:$0xff] }
  0x5a   :  { %1742 = vmatmul.mubr.msk.f32.gmra.mrb[4].mxu0 %vm105_vm3, %v2988_v30  ;;  %v3065_v5 = vpack.c.bf16 %v335_v4, %v334_v3  ;;  %v336_v1 = vld [vmem:[#allocation7 + $0x10] sm:$0xff]  ;;  %v337_v6 = vld [vmem:[#allocation7 + $0x18] sm:$0xff]  ;;  %v338_v8 = vld [vmem:[#allocation7 + $0x20] sm:$0xff] }
  0x5b   :  { %2227 = vmatpush1.bf16.msra.mxu0 %v2985_v29  ;;  %210 = vmatprep.mubr.f32.mxu0 %v2862_v0  ;;  %v3069_v7 = vpack.c.bf16 %v337_v6, %v336_v1  ;;  %v339_v9 = vld [vmem:[#allocation7 + $0x28] sm:$0xff]  ;;  %v340_v11 = vld [vmem:[#allocation7 + $0x30] sm:$0xff]  ;;  %v341_v12 = vld [vmem:[#allocation7 + $0x38] sm:$0xff] }
  0x5c   :  { %2229 = vmatprep.subr.bf16.mxu0 %v2991_v31  ;;  %2212 = vmatprep.subr.msk.bf16.mxu1 %vm2956_vm2, %v2210_v63  ;;  %v3073_v10 = vpack.c.bf16 %v339_v9, %v338_v8  ;;  %v3077_v14 = vpack.c.bf16 %v341_v12, %v340_v11  ;;  %v342_v15 = vld [vmem:[#allocation7 + $0x40] sm:$0xff]  ;;  %v343_v18 = vld [vmem:[#allocation7 + $0x48] sm:$0xff]  ;;  %v344_v20 = vld [vmem:[#allocation7 + $0x50] sm:$0xff] }
  0x5d   :  { %2215 = vmatpush3.bf16.msk.msra.mxu1 %vm2956_vm2, %v2210_v63  ;;  %v3081_v19 = vpack.c.bf16 %v343_v18, %v342_v15  ;;  %v345_v21 = vld [vmem:[#allocation7 + $0x58] sm:$0xff]  ;;  %v346_v25 = vld [vmem:[#allocation7 + $0x60] sm:$0xff]  ;;  %v347_v26 = vld [vmem:[#allocation7 + $0x68] sm:$0xff]  ;;  %v100_v18 = vsub.s32 2, %v91_v34 }
  0x5e   :  { %1743 = vmatmul.mubr.msk.f32.gmra.mrb[6].mxu0 %vm105_vm3, %v2999_v37  ;;  %2248 = vmatprep.subr.bf16.mxu1 %v2864_v2  ;;  %v3088_v27 = vpack.c.bf16 %v347_v26, %v346_v25  ;;  %v348_v28 = vld [vmem:[#allocation7 + $0x70] sm:$0xff] }
  0x5f   :  { %2231 = vmatpush1.bf16.msra.mxu0 %v2996_v36  ;;  %415 = vmatprep.mubr.f32.mxu0 %v2862_v0 }
  0x60   :  { %2233 = vmatprep.subr.bf16.mxu0 %v3002_v38  ;;  %1919 = vmatmul.mubr.msk.f32.vlgmr.msra.gmra.mrb[0].mxu1 %vm105_vm3, %v2977_v23  ;;  %v3085_v23 = vpack.c.bf16 %v345_v21, %v344_v20 }
  0x61   :  { %1921 = vmatprep.mubr.msk.f32.mxu1 %vm105_vm3, %v2988_v30  ;;  %2250 = vmatpush3.bf16.msra.mxu1 %v3065_v5  ;;  %v349_v30 = vld [vmem:[#allocation7 + $0x78] sm:$0xff] }
  0x62   :  { %2251 = vmatprep.subr.bf16.mxu1 %v2864_v2  ;;  %v3094_v32 = vpack.c.bf16 %v349_v30, %v348_v28 }
  0x63   :  { %2235 = vmatpush1.bf16.msra.mxu0 %v3007_v43 }
  0x64   :  { %2237 = vmatprep.subr.bf16.mxu0 %v3011_v44  ;;  %1922 = vmatmul.mubr.msk.f32.gmra.mrb[2].mxu1 %vm105_vm3, %v2999_v37  ;;  %v88_v37 = vld [vmem:[%s3401_s3] sm:$0x7] }
  0x65   :  { %2253 = vmatpush3.bf16.msra.mxu1 %v3069_v7  ;;  %1956 = vmatprep.mubr.msk.f32.mxu1 %vm2865_vm4, %v2862_v0  ;;  %v93_v42 = vrot.slane %v88_v37, %v92_v35  ;;  %v97_v45 = vrot.slane %v88_v37, %v96_v40  ;;  %v101_v20 = vrot.slane %v88_v37, %v100_v18 }
  0x66   :  { %2254 = vmatprep.subr.bf16.mxu1 %v2864_v2 }
  0x67   :  { %2239 = vmatpush1.bf16.msra.mxu0 %v3014_v49 }
  0x68   :  { %2241 = vmatprep.subr.bf16.mxu0 %v3017_v50 }
  0x69   :  { %2256 = vmatpush3.bf16.msra.mxu1 %v3073_v10 }
  0x6a   :  { %2257 = vmatprep.subr.bf16.mxu1 %v2864_v2 }
  0x6b   :  { %2243 = vmatpush1.bf16.msra.mxu0 %v3020_v55 }
  0x6c   :  { %2245 = vmatprep.subr.bf16.mxu0 %v3023_v56 }
  0x6d   :  { %2259 = vmatpush3.bf16.msra.mxu1 %v3077_v14 }
  0x6e   :  { %2260 = vmatprep.subr.bf16.mxu1 %v2864_v2 }
  0x6f   :  { %2247 = vmatpush1.bf16.msra.mxu0 %v3026_v59 }
  0x70   :  { %2273 = vmatprep.subr.bf16.mxu0 %v2963_v13 }
  0x71   :  { %2262 = vmatpush3.bf16.msra.mxu1 %v3081_v19 }
  0x72   :  { %416 = vmatmul.mubr.f32.vlgmr.msra.gmra.mrb[8].mxu0 %v3033_v60  ;;  %2263 = vmatprep.subr.bf16.mxu1 %v2864_v2 }
  0x73   :  { %2275 = vmatpush1.bf16.msra.mxu0 %v2967_v16  ;;  %578 = vmatprep.mubr.f32.mxu0 %v2862_v0 }
  0x74   :  { %2277 = vmatprep.subr.bf16.mxu0 %v2970_v17 }
  0x75   :  { %2265 = vmatpush3.bf16.msra.mxu1 %v3085_v23 }
  0x76   :  { %2266 = vmatprep.subr.bf16.mxu1 %v2864_v2 }
  0x77   :  { %2279 = vmatpush1.bf16.msra.mxu0 %v2974_v22 }
  0x78   :  { %2281 = vmatprep.subr.bf16.mxu0 %v2980_v24 }
  0x79   :  { %2268 = vmatpush3.bf16.msra.mxu1 %v3088_v27 }
  0x7a   :  { %2269 = vmatprep.subr.bf16.mxu1 %v2864_v2 }
  0x7b   :  { %2283 = vmatpush1.bf16.msra.mxu0 %v2985_v29 }
  0x7c   :  { %2285 = vmatprep.subr.bf16.mxu0 %v2991_v31 }
  0x7d   :  { %2271 = vmatpush3.bf16.msra.mxu1 %v3094_v32 }
  0x7e   :  { %2304 = vmatprep.subr.bf16.mxu1 %v2864_v2 }
  0x7f   :  { %2287 = vmatpush1.bf16.msra.mxu0 %v2996_v36 }
  0x80   :  { %2289 = vmatprep.subr.bf16.mxu0 %v3002_v38 }
  0x83   :  { %2291 = vmatpush1.bf16.msra.mxu0 %v3007_v43 }
  0x84   :  { %2293 = vmatprep.subr.bf16.mxu0 %v3011_v44 }
  0x87   :  { %2295 = vmatpush1.bf16.msra.mxu0 %v3014_v49 }
  0x88   :  { %2297 = vmatprep.subr.bf16.mxu0 %v3017_v50 }
  0x8b   :  { %2299 = vmatpush1.bf16.msra.mxu0 %v3020_v55 }
  0x8c   :  { %2301 = vmatprep.subr.bf16.mxu0 %v3023_v56 }
  0x8f   :  { %2303 = vmatpush1.bf16.msra.mxu0 %v3026_v59 }
  0x90   :  { %2329 = vmatprep.subr.bf16.mxu0 %v2963_v13 }
 0x125   :  { %v194_v39 = vpop.f32.mrb[0].mxu0 }
 0x126   :  { %v196_v41 = vpop.f32.mrb[1].mxu0  ;;  %v3114_v3 = vadd.f32 %v194_v39, %v93_v42 }
 0x127   :  { %v197_v39 = vadd.f32 %v196_v41, %v97_v45 }
 0x129   :  { %v200_v46 = vpop.f32.mrb[2].mxu0 }
 0x12a   :  { %v3102_v47 = vadd.f32 %v200_v46, %v93_v42  ;;  %v202_v48 = vpop.f32.mrb[3].mxu0 }
 0x12b   :  { %v3104_v51 = vadd.f32 %v202_v48, %v97_v45 }
 0x12d   :  { %v206_v52 = vpop.f32.mrb[4].mxu0 }
 0x12e   :  { %v3106_v53 = vadd.f32 %v206_v52, %v93_v42  ;;  %v208_v54 = vpop.f32.mrb[5].mxu0 }
 0x12f   :  { %v3108_v57 = vadd.f32 %v208_v54, %v97_v45 }
 0x131   :  { %v212_v58 = vpop.f32.mrb[6].mxu0 }
 0x132   :  { %v3110_v61 = vadd.f32 %v212_v58, %v93_v42  ;;  %v214_v62 = vpop.f32.mrb[7].mxu0 }
 0x133   :  { %v3112_v63 = vadd.f32 %v214_v62, %v97_v45  ;;  %v1920_v21 = vpop.f32.mrb[0].mxu1 }
 0x134   :  { %v3136_v25 = vadd.f32 %v1920_v21, %v101_v20  ;;  %v283_v26 = vpop.f32.mrb[1].mxu1 }
 0x135   :  { %v3142_v52 = vadd.f32 %v283_v26, %v101_v20 }
 0x137   :  { %v1923_v28 = vpop.f32.mrb[2].mxu1 }
 0x138   :  { %v3138_v30 = vadd.f32 %v1923_v28, %v101_v20  ;;  %v293_v33 = vpop.f32.mrb[3].mxu1 }
 0x139   :  { %v3140_v35 = vadd.f32 %v293_v33, %v101_v20 }
 0x145   :  { %v417_v4 = vpop.f32.mrb[8].mxu0 }
 0x146   :  { %v422_v1 = vadd.f32 %v417_v4, %v3114_v3  ;;  %v419_v6 = vpop.f32.mrb[9].mxu0 }
 0x147   :  { %v423_v40 = vadd.f32 %v419_v6, %v197_v39 }
 0x148   :  { %v1749_v8 = vmul.f32 -1.442695, %v422_v1 }
 0x149   :  { %v1750_v42 = vmul.f32 -1.442695, %v423_v40 }
 0x14a   :  { %2678 = vpow2.f32 %v1749_v8 }
 0x154   :  { %v2679_v9 = vpop.eup %2678 }
 0x155   :  { %v430_v11 = vadd.f32 1.0, %v2679_v9 }
 0x157   :  { %2680 = vrcp.f32 %v430_v11 }
 0x158   :  { %2682 = vpow2.f32 %v1750_v42 }
 0x161   :  { %v2681_v12 = vpop.eup %2680 }
 0x162   :  { %v436_v15 = vmul.f32 %v2681_v12, %v3033_v60  ;;  %v2683_v46 = vpop.eup %2682 }
 0x163   :  { %v431_v48 = vadd.f32 1.0, %v2683_v46 }
 0x164   :  { %1957 = vmatmul.mubr.f32.vlgmr.msra.gmra.mrb[4].mxu1 %v436_v15 }
 0x165   :  { %2306 = vmatpush3.bf16.msra.mxu1 %v3065_v5  ;;  %1991 = vmatprep.mubr.msk.f32.mxu1 %vm2865_vm4, %v2862_v0  ;;  %2684 = vrcp.f32 %v431_v48 }
 0x166   :  { %2307 = vmatprep.subr.bf16.mxu1 %v2864_v2 }
 0x169   :  { %2309 = vmatpush3.bf16.msra.mxu1 %v3069_v7 }
 0x16a   :  { %2310 = vmatprep.subr.bf16.mxu1 %v2864_v2 }
 0x16d   :  { %2312 = vmatpush3.bf16.msra.mxu1 %v3073_v10 }
 0x16e   :  { %2313 = vmatprep.subr.bf16.mxu1 %v2864_v2 }
 0x16f   :  { %v2685_v58 = vpop.eup %2684 }
 0x170   :  { %v510_v62 = vsub.f32 1.0, %v2685_v58  ;;  %v509_v1 = vmul.f32 %v2685_v58, %v3033_v60 }
 0x171   :  { %2315 = vmatpush3.bf16.msra.mxu1 %v3077_v14 }
 0x172   :  { %2316 = vmatprep.subr.bf16.mxu1 %v2864_v2 }
 0x175   :  { %2318 = vmatpush3.bf16.msra.mxu1 %v3081_v19 }
 0x176   :  { %2319 = vmatprep.subr.bf16.mxu1 %v2864_v2 }
 0x179   :  { %2321 = vmatpush3.bf16.msra.mxu1 %v3085_v23 }
 0x17a   :  { %2322 = vmatprep.subr.bf16.mxu1 %v2864_v2 }
 0x17d   :  { %2324 = vmatpush3.bf16.msra.mxu1 %v3088_v27 }
 0x17e   :  { %2325 = vmatprep.subr.bf16.mxu1 %v2864_v2 }
 0x181   :  { %2327 = vmatpush3.bf16.msra.mxu1 %v3094_v32 }
 0x182   :  { %2360 = vmatprep.subr.bf16.mxu1 %v2864_v2 }
 0x237   :  { %v503_v34 = vpop.f32.mrb[4].mxu1 }
 0x238   :  { %v507_v37 = vadd.f32 %v503_v34, %v3142_v52  ;;  %v1958_v54 = vpop.f32.mrb[5].mxu1 }
 0x23a   :  { %2686 = vtanh.f32 %v507_v37 }
 0x244   :  { %v2687_v4 = vpop.eup %2686 }
 0x245   :  { %v511_v8 = vmul.f32 %v2687_v4, %v510_v62 }
 0x247   :  { %v512_v41 = vadd.f32 %v511_v8, %v509_v1 }
 0x249   :  { %513 = vst [vmem:[%s3404_s6] sm:$0xf] %v512_v41  ;;  %579 = vmatmul.mubr.f32.vlgmr.msra.gmra.mrb[10].mxu0 %v512_v41  ;;  %v606_v33 = vrot.slane %v512_v41, 4 }
 0x24a   :  { %2331 = vmatpush1.bf16.msra.mxu0 %v2967_v16  ;;  %760 = vmatprep.mubr.f32.mxu0 %v2862_v0 }
 0x24b   :  { %2333 = vmatprep.subr.bf16.mxu0 %v2970_v17 }
 0x24e   :  { %2335 = vmatpush1.bf16.msra.mxu0 %v2974_v22 }
 0x24f   :  { %2337 = vmatprep.subr.bf16.mxu0 %v2980_v24 }
 0x252   :  { %2339 = vmatpush1.bf16.msra.mxu0 %v2985_v29 }
 0x253   :  { %2341 = vmatprep.subr.bf16.mxu0 %v2991_v31 }
 0x256   :  { %2343 = vmatpush1.bf16.msra.mxu0 %v2996_v36 }
 0x257   :  { %2345 = vmatprep.subr.bf16.mxu0 %v3002_v38 }
 0x25a   :  { %2347 = vmatpush1.bf16.msra.mxu0 %v3007_v43 }
 0x25b   :  { %2349 = vmatprep.subr.bf16.mxu0 %v3011_v44 }
 0x25e   :  { %2351 = vmatpush1.bf16.msra.mxu0 %v3014_v49 }
 0x25f   :  { %2353 = vmatprep.subr.bf16.mxu0 %v3017_v50 }
 0x262   :  { %2355 = vmatpush1.bf16.msra.mxu0 %v3020_v55 }
 0x263   :  { %2357 = vmatprep.subr.bf16.mxu0 %v3023_v56 }
 0x266   :  { %2359 = vmatpush1.bf16.msra.mxu0 %v3026_v59 }
 0x267   :  { %2385 = vmatprep.subr.bf16.mxu0 %v2963_v13 }
 0x31c   :  { %v580_v60 = vpop.f32.mrb[10].mxu0 }
 0x31d   :  { %v587_v45 = vrot.slane %v580_v60, 4  ;;  %v582_v6 = vpop.f32.mrb[11].mxu0 }
 0x31e   :  { %v588_v9 = vrot.slane %v582_v6, 4 }
 0x31f   :  { %v591_v11 = vadd.f32 %v587_v45, %v3114_v3 }
 0x320   :  { %v592_v12 = vadd.f32 %v588_v9, %v197_v39 }
 0x321   :  { %v1751_v15 = vmul.f32 -1.442695, %v591_v11 }
 0x322   :  { %v1752_v18 = vmul.f32 -1.442695, %v592_v12 }
 0x323   :  { %2688 = vpow2.f32 %v1751_v15 }
 0x324   :  { %2690 = vpow2.f32 %v1752_v18 }
 0x32d   :  { %v2689_v20 = vpop.eup %2688 }
 0x32e   :  { %v2691_v21 = vpop.eup %2690  ;;  %v599_v26 = vadd.f32 1.0, %v2689_v20 }
 0x32f   :  { %v600_v28 = vadd.f32 1.0, %v2691_v21 }
 0x330   :  { %2692 = vrcp.f32 %v599_v26 }
 0x331   :  { %2694 = vrcp.f32 %v600_v28 }
 0x33a   :  { %v2693_v40 = vpop.eup %2692 }
 0x33b   :  { %v2695_v42 = vpop.eup %2694  ;;  %v608_v46 = vmul.f32 %v2693_v40, %v606_v33 }
 0x33c   :  { %v687_v48 = vmul.f32 %v2695_v42, %v606_v33  ;;  %v688_v58 = vsub.f32 1.0, %v2695_v42 }
 0x33d   :  { %v610_v34 = vrot.slane %v608_v46, 4 }
 0x33f   :  { %1992 = vmatmul.mubr.f32.vlgmr.msra.gmra.mrb[6].mxu1 %v610_v34 }
 0x340   :  { %2362 = vmatpush3.bf16.msra.mxu1 %v3065_v5  ;;  %2026 = vmatprep.mubr.msk.f32.mxu1 %vm2865_vm4, %v2862_v0 }
 0x341   :  { %2363 = vmatprep.subr.bf16.mxu1 %v2864_v2 }
 0x344   :  { %2365 = vmatpush3.bf16.msra.mxu1 %v3069_v7 }
 0x345   :  { %2366 = vmatprep.subr.bf16.mxu1 %v2864_v2 }
 0x348   :  { %2368 = vmatpush3.bf16.msra.mxu1 %v3073_v10 }
 0x349   :  { %2369 = vmatprep.subr.bf16.mxu1 %v2864_v2 }
 0x34c   :  { %2371 = vmatpush3.bf16.msra.mxu1 %v3077_v14 }
 0x34d   :  { %2372 = vmatprep.subr.bf16.mxu1 %v2864_v2 }
 0x350   :  { %2374 = vmatpush3.bf16.msra.mxu1 %v3081_v19 }
 0x351   :  { %2375 = vmatprep.subr.bf16.mxu1 %v2864_v2 }
 0x354   :  { %2377 = vmatpush3.bf16.msra.mxu1 %v3085_v23 }
 0x355   :  { %2378 = vmatprep.subr.bf16.mxu1 %v2864_v2 }
 0x358   :  { %2380 = vmatpush3.bf16.msra.mxu1 %v3088_v27 }
 0x359   :  { %2381 = vmatprep.subr.bf16.mxu1 %v2864_v2 }
 0x35c   :  { %2383 = vmatpush3.bf16.msra.mxu1 %v3094_v32 }
 0x35d   :  { %2416 = vmatprep.subr.bf16.mxu1 %v2864_v2 }
 0x412   :  { %v678_v3 = vpop.f32.mrb[6].mxu1 }
 0x413   :  { %v683_v39 = vrot.slane %v678_v3, 4  ;;  %v1993_v37 = vpop.f32.mrb[7].mxu1 }
 0x415   :  { %v685_v54 = vadd.f32 %v683_v39, %v3142_v52 }
 0x417   :  { %2696 = vtanh.f32 %v685_v54 }
 0x421   :  { %v2697_v62 = vpop.eup %2696 }
 0x422   :  { %v689_v4 = vmul.f32 %v2697_v62, %v688_v58 }
 0x424   :  { %v690_v1 = vadd.f32 %v689_v4, %v687_v48 }
 0x426   :  { %1753 = vst [vmem:[%s3404_s6] sm:$0xf0] %v690_v1  ;;  %v694_v8 = vrot.slane %v690_v1, 4 }
 0x428   :  { %761 = vmatmul.mubr.f32.vlgmr.msra.gmra.mrb[12].mxu0 %v694_v8 }
 0x429   :  { %2387 = vmatpush1.bf16.msra.mxu0 %v2967_v16  ;;  %924 = vmatprep.mubr.f32.mxu0 %v2862_v0 }
 0x42a   :  { %2389 = vmatprep.subr.bf16.mxu0 %v2970_v17 }
 0x42d   :  { %2391 = vmatpush1.bf16.msra.mxu0 %v2974_v22 }
 0x42e   :  { %2393 = vmatprep.subr.bf16.mxu0 %v2980_v24 }
 0x431   :  { %2395 = vmatpush1.bf16.msra.mxu0 %v2985_v29 }
 0x432   :  { %2397 = vmatprep.subr.bf16.mxu0 %v2991_v31 }
 0x435   :  { %2399 = vmatpush1.bf16.msra.mxu0 %v2996_v36 }
 0x436   :  { %2401 = vmatprep.subr.bf16.mxu0 %v3002_v38 }
 0x439   :  { %2403 = vmatpush1.bf16.msra.mxu0 %v3007_v43 }
 0x43a   :  { %2405 = vmatprep.subr.bf16.mxu0 %v3011_v44 }
 0x43d   :  { %2407 = vmatpush1.bf16.msra.mxu0 %v3014_v49 }
 0x43e   :  { %2409 = vmatprep.subr.bf16.mxu0 %v3017_v50 }
 0x441   :  { %2411 = vmatpush1.bf16.msra.mxu0 %v3020_v55 }
 0x442   :  { %2413 = vmatprep.subr.bf16.mxu0 %v3023_v56 }
 0x445   :  { %2415 = vmatpush1.bf16.msra.mxu0 %v3026_v59 }
 0x446   :  { %2441 = vmatprep.subr.bf16.mxu0 %v2963_v13 }
 0x4fb   :  { %v762_v52 = vpop.f32.mrb[12].mxu0 }
 0x4fc   :  { %v767_v41 = vadd.f32 %v762_v52, %v3102_v47  ;;  %v764_v60 = vpop.f32.mrb[13].mxu0 }
 0x4fd   :  { %v768_v15 = vadd.f32 %v764_v60, %v3104_v51 }
 0x4fe   :  { %v1754_v45 = vmul.f32 -1.442695, %v767_v41 }
 0x4ff   :  { %v1755_v18 = vmul.f32 -1.442695, %v768_v15 }
 0x500   :  { %2698 = vpow2.f32 %v1754_v45 }
 0x50a   :  { %v2699_v6 = vpop.eup %2698 }
 0x50b   :  { %v775_v9 = vadd.f32 1.0, %v2699_v6 }
 0x50d   :  { %2700 = vrcp.f32 %v775_v9 }
 0x50e   :  { %2702 = vpow2.f32 %v1755_v18 }
 0x517   :  { %v2701_v11 = vpop.eup %2700 }
 0x518   :  { %v781_v12 = vmul.f32 %v2701_v11, %v694_v8  ;;  %v2703_v20 = vpop.eup %2702 }
 0x519   :  { %v776_v21 = vadd.f32 1.0, %v2703_v20 }
 0x51a   :  { %2027 = vmatmul.mubr.f32.vlgmr.msra.gmra.mrb[8].mxu1 %v781_v12 }
 0x51b   :  { %2418 = vmatpush3.bf16.msra.mxu1 %v3065_v5  ;;  %2061 = vmatprep.mubr.msk.f32.mxu1 %vm2865_vm4, %v2862_v0  ;;  %2704 = vrcp.f32 %v776_v21 }
 0x51c   :  { %2419 = vmatprep.subr.bf16.mxu1 %v2864_v2 }
 0x51f   :  { %2421 = vmatpush3.bf16.msra.mxu1 %v3069_v7 }
 0x520   :  { %2422 = vmatprep.subr.bf16.mxu1 %v2864_v2 }
 0x523   :  { %2424 = vmatpush3.bf16.msra.mxu1 %v3073_v10 }
 0x524   :  { %2425 = vmatprep.subr.bf16.mxu1 %v2864_v2 }
 0x525   :  { %v2705_v40 = vpop.eup %2704 }
 0x526   :  { %v855_v42 = vsub.f32 1.0, %v2705_v40  ;;  %v854_v48 = vmul.f32 %v2705_v40, %v694_v8 }
 0x527   :  { %2427 = vmatpush3.bf16.msra.mxu1 %v3077_v14 }
 0x528   :  { %2428 = vmatprep.subr.bf16.mxu1 %v2864_v2 }
 0x52b   :  { %2430 = vmatpush3.bf16.msra.mxu1 %v3081_v19 }
 0x52c   :  { %2431 = vmatprep.subr.bf16.mxu1 %v2864_v2 }
 0x52f   :  { %2433 = vmatpush3.bf16.msra.mxu1 %v3085_v23 }
 0x530   :  { %2434 = vmatprep.subr.bf16.mxu1 %v2864_v2 }
 0x533   :  { %2436 = vmatpush3.bf16.msra.mxu1 %v3088_v27 }
 0x534   :  { %2437 = vmatprep.subr.bf16.mxu1 %v2864_v2 }
 0x537   :  { %2439 = vmatpush3.bf16.msra.mxu1 %v3094_v32 }
 0x538   :  { %2472 = vmatprep.subr.bf16.mxu1 %v2864_v2 }
 0x5ed   :  { %v848_v26 = vpop.f32.mrb[8].mxu1 }
 0x5ee   :  { %v852_v28 = vadd.f32 %v848_v26, %v3136_v25  ;;  %v2028_v33 = vpop.f32.mrb[9].mxu1 }
 0x5f0   :  { %2706 = vtanh.f32 %v852_v28 }
 0x5fa   :  { %v2707_v46 = vpop.eup %2706 }
 0x5fb   :  { %v856_v34 = vmul.f32 %v2707_v46, %v855_v42 }
 0x5fd   :  { %v857_v3 = vadd.f32 %v856_v34, %v854_v48 }
 0x5ff   :  { %1756 = vst [vmem:[%s3404_s6 + $0x8] sm:$0xf] %v857_v3  ;;  %925 = vmatmul.mubr.f32.vlgmr.msra.gmra.mrb[14].mxu0 %v857_v3  ;;  %v952_v6 = vrot.slane %v857_v3, 4 }
 0x600   :  { %2443 = vmatpush1.bf16.msra.mxu0 %v2967_v16  ;;  %1106 = vmatprep.mubr.f32.mxu0 %v2862_v0 }
 0x601   :  { %2445 = vmatprep.subr.bf16.mxu0 %v2970_v17 }
 0x604   :  { %2447 = vmatpush1.bf16.msra.mxu0 %v2974_v22 }
 0x605   :  { %2449 = vmatprep.subr.bf16.mxu0 %v2980_v24 }
 0x608   :  { %2451 = vmatpush1.bf16.msra.mxu0 %v2985_v29 }
 0x609   :  { %2453 = vmatprep.subr.bf16.mxu0 %v2991_v31 }
 0x60c   :  { %2455 = vmatpush1.bf16.msra.mxu0 %v2996_v36 }
 0x60d   :  { %2457 = vmatprep.subr.bf16.mxu0 %v3002_v38 }
 0x610   :  { %2459 = vmatpush1.bf16.msra.mxu0 %v3007_v43 }
 0x611   :  { %2461 = vmatprep.subr.bf16.mxu0 %v3011_v44 }
 0x614   :  { %2463 = vmatpush1.bf16.msra.mxu0 %v3014_v49 }
 0x615   :  { %2465 = vmatprep.subr.bf16.mxu0 %v3017_v50 }
 0x618   :  { %2467 = vmatpush1.bf16.msra.mxu0 %v3020_v55 }
 0x619   :  { %2469 = vmatprep.subr.bf16.mxu0 %v3023_v56 }
 0x61c   :  { %2471 = vmatpush1.bf16.msra.mxu0 %v3026_v59 }
 0x61d   :  { %2497 = vmatprep.subr.bf16.mxu0 %v2963_v13 }
 0x6d2   :  { %v926_v39 = vpop.f32.mrb[14].mxu0 }
 0x6d3   :  { %v933_v37 = vrot.slane %v926_v39, 4  ;;  %v928_v54 = vpop.f32.mrb[15].mxu0 }
 0x6d4   :  { %v934_v58 = vrot.slane %v928_v54, 4 }
 0x6d5   :  { %v937_v62 = vadd.f32 %v933_v37, %v3102_v47 }
 0x6d6   :  { %v938_v4 = vadd.f32 %v934_v58, %v3104_v51 }
 0x6d7   :  { %v1757_v1 = vmul.f32 -1.442695, %v937_v62 }
 0x6d8   :  { %v1758_v8 = vmul.f32 -1.442695, %v938_v4 }
 0x6d9   :  { %2708 = vpow2.f32 %v1757_v1 }
 0x6da   :  { %2710 = vpow2.f32 %v1758_v8 }
 0x6e3   :  { %v2709_v52 = vpop.eup %2708 }
 0x6e4   :  { %v2711_v41 = vpop.eup %2710  ;;  %v945_v60 = vadd.f32 1.0, %v2709_v52 }
 0x6e5   :  { %v946_v45 = vadd.f32 1.0, %v2711_v41 }
 0x6e6   :  { %2712 = vrcp.f32 %v945_v60 }
 0x6e7   :  { %2714 = vrcp.f32 %v946_v45 }
 0x6f0   :  { %v2713_v9 = vpop.eup %2712 }
 0x6f1   :  { %v2715_v11 = vpop.eup %2714  ;;  %v954_v12 = vmul.f32 %v2713_v9, %v952_v6 }
 0x6f2   :  { %v1033_v15 = vmul.f32 %v2715_v11, %v952_v6  ;;  %v1034_v26 = vsub.f32 1.0, %v2715_v11 }
 0x6f3   :  { %v956_v18 = vrot.slane %v954_v12, 4 }
 0x6f5   :  { %2062 = vmatmul.mubr.f32.vlgmr.msra.gmra.mrb[10].mxu1 %v956_v18 }
 0x6f6   :  { %2474 = vmatpush3.bf16.msra.mxu1 %v3065_v5  ;;  %2096 = vmatprep.mubr.msk.f32.mxu1 %vm2865_vm4, %v2862_v0 }
 0x6f7   :  { %2475 = vmatprep.subr.bf16.mxu1 %v2864_v2 }
 0x6fa   :  { %2477 = vmatpush3.bf16.msra.mxu1 %v3069_v7 }
 0x6fb   :  { %2478 = vmatprep.subr.bf16.mxu1 %v2864_v2 }
 0x6fe   :  { %2480 = vmatpush3.bf16.msra.mxu1 %v3073_v10 }
 0x6ff   :  { %2481 = vmatprep.subr.bf16.mxu1 %v2864_v2 }
 0x702   :  { %2483 = vmatpush3.bf16.msra.mxu1 %v3077_v14 }
 0x703   :  { %2484 = vmatprep.subr.bf16.mxu1 %v2864_v2 }
 0x706   :  { %2486 = vmatpush3.bf16.msra.mxu1 %v3081_v19 }
 0x707   :  { %2487 = vmatprep.subr.bf16.mxu1 %v2864_v2 }
 0x70a   :  { %2489 = vmatpush3.bf16.msra.mxu1 %v3085_v23 }
 0x70b   :  { %2490 = vmatprep.subr.bf16.mxu1 %v2864_v2 }
 0x70e   :  { %2492 = vmatpush3.bf16.msra.mxu1 %v3088_v27 }
 0x70f   :  { %2493 = vmatprep.subr.bf16.mxu1 %v2864_v2 }
 0x712   :  { %2495 = vmatpush3.bf16.msra.mxu1 %v3094_v32 }
 0x713   :  { %2528 = vmatprep.subr.bf16.mxu1 %v2864_v2 }
 0x7c8   :  { %v1024_v47 = vpop.f32.mrb[10].mxu1 }
 0x7c9   :  { %v1029_v51 = vrot.slane %v1024_v47, 4  ;;  %v2063_v20 = vpop.f32.mrb[11].mxu1 }
 0x7cb   :  { %v1031_v21 = vadd.f32 %v1029_v51, %v3136_v25 }
 0x7cd   :  { %2716 = vtanh.f32 %v1031_v21 }
 0x7d7   :  { %v2717_v28 = vpop.eup %2716 }
 0x7d8   :  { %v1035_v33 = vmul.f32 %v2717_v28, %v1034_v26 }
 0x7da   :  { %v1036_v40 = vadd.f32 %v1035_v33, %v1033_v15 }
 0x7dc   :  { %1759 = vst [vmem:[%s3404_s6 + $0x8] sm:$0xf0] %v1036_v40  ;;  %v1040_v42 = vrot.slane %v1036_v40, 4 }
 0x7de   :  { %1107 = vmatmul.mubr.f32.vlgmr.msra.gmra.mrb[16].mxu0 %v1040_v42 }
 0x7df   :  { %2499 = vmatpush1.bf16.msra.mxu0 %v2967_v16  ;;  %1270 = vmatprep.mubr.f32.mxu0 %v2862_v0 }
 0x7e0   :  { %2501 = vmatprep.subr.bf16.mxu0 %v2970_v17 }
 0x7e3   :  { %2503 = vmatpush1.bf16.msra.mxu0 %v2974_v22 }
 0x7e4   :  { %2505 = vmatprep.subr.bf16.mxu0 %v2980_v24 }
 0x7e7   :  { %2507 = vmatpush1.bf16.msra.mxu0 %v2985_v29 }
 0x7e8   :  { %2509 = vmatprep.subr.bf16.mxu0 %v2991_v31 }
 0x7eb   :  { %2511 = vmatpush1.bf16.msra.mxu0 %v2996_v36 }
 0x7ec   :  { %2513 = vmatprep.subr.bf16.mxu0 %v3002_v38 }
 0x7ef   :  { %2515 = vmatpush1.bf16.msra.mxu0 %v3007_v43 }
 0x7f0   :  { %2517 = vmatprep.subr.bf16.mxu0 %v3011_v44 }
 0x7f3   :  { %2519 = vmatpush1.bf16.msra.mxu0 %v3014_v49 }
 0x7f4   :  { %2521 = vmatprep.subr.bf16.mxu0 %v3017_v50 }
 0x7f7   :  { %2523 = vmatpush1.bf16.msra.mxu0 %v3020_v55 }
 0x7f8   :  { %2525 = vmatprep.subr.bf16.mxu0 %v3023_v56 }
 0x7fb   :  { %2527 = vmatpush1.bf16.msra.mxu0 %v3026_v59 }
 0x7fc   :  { %2553 = vmatprep.subr.bf16.mxu0 %v2963_v13 }
 0x8b1   :  { %v1108_v25 = vpop.f32.mrb[16].mxu0 }
 0x8b2   :  { %v1113_v46 = vadd.f32 %v1108_v25, %v3106_v53  ;;  %v1110_v48 = vpop.f32.mrb[17].mxu0 }
 0x8b3   :  { %v1114_v58 = vadd.f32 %v1110_v48, %v3108_v57 }
 0x8b4   :  { %v1760_v34 = vmul.f32 -1.442695, %v1113_v46 }
 0x8b5   :  { %v1761_v62 = vmul.f32 -1.442695, %v1114_v58 }
 0x8b6   :  { %2718 = vpow2.f32 %v1760_v34 }
 0x8c0   :  { %v2719_v3 = vpop.eup %2718 }
 0x8c1   :  { %v1121_v39 = vadd.f32 1.0, %v2719_v3 }
 0x8c3   :  { %2720 = vrcp.f32 %v1121_v39 }
 0x8c4   :  { %2722 = vpow2.f32 %v1761_v62 }
 0x8cd   :  { %v2721_v37 = vpop.eup %2720 }
 0x8ce   :  { %v1127_v54 = vmul.f32 %v2721_v37, %v1040_v42  ;;  %v2723_v4 = vpop.eup %2722 }
 0x8cf   :  { %v1122_v1 = vadd.f32 1.0, %v2723_v4 }
 0x8d0   :  { %2097 = vmatmul.mubr.f32.vlgmr.msra.gmra.mrb[12].mxu1 %v1127_v54 }
 0x8d1   :  { %2530 = vmatpush3.bf16.msra.mxu1 %v3065_v5  ;;  %2131 = vmatprep.mubr.msk.f32.mxu1 %vm2865_vm4, %v2862_v0  ;;  %2724 = vrcp.f32 %v1122_v1 }
 0x8d2   :  { %2531 = vmatprep.subr.bf16.mxu1 %v2864_v2 }
 0x8d5   :  { %2533 = vmatpush3.bf16.msra.mxu1 %v3069_v7 }
 0x8d6   :  { %2534 = vmatprep.subr.bf16.mxu1 %v2864_v2 }
 0x8d9   :  { %2536 = vmatpush3.bf16.msra.mxu1 %v3073_v10 }
 0x8da   :  { %2537 = vmatprep.subr.bf16.mxu1 %v2864_v2 }
 0x8db   :  { %v2725_v60 = vpop.eup %2724 }
 0x8dc   :  { %v1201_v45 = vsub.f32 1.0, %v2725_v60  ;;  %v1200_v9 = vmul.f32 %v2725_v60, %v1040_v42 }
 0x8dd   :  { %2539 = vmatpush3.bf16.msra.mxu1 %v3077_v14 }
 0x8de   :  { %2540 = vmatprep.subr.bf16.mxu1 %v2864_v2 }
 0x8e1   :  { %2542 = vmatpush3.bf16.msra.mxu1 %v3081_v19 }
 0x8e2   :  { %2543 = vmatprep.subr.bf16.mxu1 %v2864_v2 }
 0x8e5   :  { %2545 = vmatpush3.bf16.msra.mxu1 %v3085_v23 }
 0x8e6   :  { %2546 = vmatprep.subr.bf16.mxu1 %v2864_v2 }
 0x8e9   :  { %2548 = vmatpush3.bf16.msra.mxu1 %v3088_v27 }
 0x8ea   :  { %2549 = vmatprep.subr.bf16.mxu1 %v2864_v2 }
 0x8ed   :  { %2551 = vmatpush3.bf16.msra.mxu1 %v3094_v32 }
 0x8ee   :  { %2584 = vmatprep.subr.bf16.mxu1 %v2864_v2 }
 0x9a3   :  { %v1194_v8 = vpop.f32.mrb[12].mxu1 }
 0x9a4   :  { %v1198_v52 = vadd.f32 %v1194_v8, %v3140_v35  ;;  %v2098_v41 = vpop.f32.mrb[13].mxu1 }
 0x9a6   :  { %2726 = vtanh.f32 %v1198_v52 }
 0x9b0   :  { %v2727_v6 = vpop.eup %2726 }
 0x9b1   :  { %v1202_v11 = vmul.f32 %v2727_v6, %v1201_v45 }
 0x9b3   :  { %v1203_v12 = vadd.f32 %v1202_v11, %v1200_v9 }
 0x9b5   :  { %1762 = vst [vmem:[%s3404_s6 + $0x10] sm:$0xf] %v1203_v12  ;;  %1271 = vmatmul.mubr.f32.vlgmr.msra.gmra.mrb[18].mxu0 %v1203_v12  ;;  %v1298_v46 = vrot.slane %v1203_v12, 4 }
 0x9b6   :  { %2555 = vmatpush1.bf16.msra.mxu0 %v2967_v16  ;;  %1452 = vmatprep.mubr.f32.mxu0 %v2862_v0 }
 0x9b7   :  { %2557 = vmatprep.subr.bf16.mxu0 %v2970_v17 }
 0x9ba   :  { %2559 = vmatpush1.bf16.msra.mxu0 %v2974_v22 }
 0x9bb   :  { %2561 = vmatprep.subr.bf16.mxu0 %v2980_v24 }
 0x9be   :  { %2563 = vmatpush1.bf16.msra.mxu0 %v2985_v29 }
 0x9bf   :  { %2565 = vmatprep.subr.bf16.mxu0 %v2991_v31 }
 0x9c2   :  { %2567 = vmatpush1.bf16.msra.mxu0 %v2996_v36 }
 0x9c3   :  { %2569 = vmatprep.subr.bf16.mxu0 %v3002_v38 }
 0x9c6   :  { %2571 = vmatpush1.bf16.msra.mxu0 %v3007_v43 }
 0x9c7   :  { %2573 = vmatprep.subr.bf16.mxu0 %v3011_v44 }
 0x9ca   :  { %2575 = vmatpush1.bf16.msra.mxu0 %v3014_v49 }
 0x9cb   :  { %2577 = vmatprep.subr.bf16.mxu0 %v3017_v50 }
 0x9ce   :  { %2579 = vmatpush1.bf16.msra.mxu0 %v3020_v55 }
 0x9cf   :  { %2581 = vmatprep.subr.bf16.mxu0 %v3023_v56 }
 0x9d2   :  { %2583 = vmatpush1.bf16.msra.mxu0 %v3026_v59 }
 0x9d3   :  { %2609 = vmatprep.subr.bf16.mxu0 %v2963_v13 }
 0xa88   :  { %v1272_v15 = vpop.f32.mrb[18].mxu0 }
 0xa89   :  { %v1279_v18 = vrot.slane %v1272_v15, 4  ;;  %v1274_v47 = vpop.f32.mrb[19].mxu0 }
 0xa8a   :  { %v1280_v51 = vrot.slane %v1274_v47, 4 }
 0xa8b   :  { %v1283_v20 = vadd.f32 %v1279_v18, %v3106_v53 }
 0xa8c   :  { %v1284_v21 = vadd.f32 %v1280_v51, %v3108_v57 }
 0xa8d   :  { %v1763_v26 = vmul.f32 -1.442695, %v1283_v20 }
 0xa8e   :  { %v1764_v28 = vmul.f32 -1.442695, %v1284_v21 }
 0xa8f   :  { %2728 = vpow2.f32 %v1763_v26 }
 0xa90   :  { %2730 = vpow2.f32 %v1764_v28 }
 0xa99   :  { %v2729_v33 = vpop.eup %2728 }
 0xa9a   :  { %v2731_v40 = vpop.eup %2730  ;;  %v1291_v42 = vadd.f32 1.0, %v2729_v33 }
 0xa9b   :  { %v1292_v25 = vadd.f32 1.0, %v2731_v40 }
 0xa9c   :  { %2732 = vrcp.f32 %v1291_v42 }
 0xa9d   :  { %2734 = vrcp.f32 %v1292_v25 }
 0xaa6   :  { %v2733_v13 = vpop.eup %2732 }
 0xaa7   :  { %v2735_v48 = vpop.eup %2734  ;;  %v1300_v34 = vmul.f32 %v2733_v13, %v1298_v46 }
 0xaa8   :  { %v1379_v3 = vmul.f32 %v2735_v48, %v1298_v46  ;;  %v1380_v58 = vsub.f32 1.0, %v2735_v48 }
 0xaa9   :  { %v1302_v39 = vrot.slane %v1300_v34, 4 }
 0xaab   :  { %2132 = vmatmul.mubr.f32.vlgmr.msra.gmra.mrb[14].mxu1 %v1302_v39 }
 0xaac   :  { %2586 = vmatpush3.bf16.msra.mxu1 %v3065_v5  ;;  %2166 = vmatprep.mubr.msk.f32.mxu1 %vm2865_vm4, %v2862_v0 }
 0xaad   :  { %2587 = vmatprep.subr.bf16.mxu1 %v2864_v2 }
 0xab0   :  { %2589 = vmatpush3.bf16.msra.mxu1 %v3069_v7 }
 0xab1   :  { %2590 = vmatprep.subr.bf16.mxu1 %v2864_v2 }
 0xab4   :  { %2592 = vmatpush3.bf16.msra.mxu1 %v3073_v10 }
 0xab5   :  { %2593 = vmatprep.subr.bf16.mxu1 %v2864_v2 }
 0xab8   :  { %2595 = vmatpush3.bf16.msra.mxu1 %v3077_v14 }
 0xab9   :  { %2596 = vmatprep.subr.bf16.mxu1 %v2864_v2 }
 0xabc   :  { %2598 = vmatpush3.bf16.msra.mxu1 %v3081_v19 }
 0xabd   :  { %2599 = vmatprep.subr.bf16.mxu1 %v2864_v2 }
 0xac0   :  { %2601 = vmatpush3.bf16.msra.mxu1 %v3085_v23 }
 0xac1   :  { %2602 = vmatprep.subr.bf16.mxu1 %v2864_v2 }
 0xac4   :  { %2604 = vmatpush3.bf16.msra.mxu1 %v3088_v27 }
 0xac5   :  { %2605 = vmatprep.subr.bf16.mxu1 %v2864_v2 }
 0xac8   :  { %2607 = vmatpush3.bf16.msra.mxu1 %v3094_v32 }
 0xac9   :  { %2640 = vmatprep.subr.bf16.mxu1 %v2864_v2 }
 0xb7e   :  { %v1370_v53 = vpop.f32.mrb[14].mxu1 }
 0xb7f   :  { %v1375_v57 = vrot.slane %v1370_v53, 4  ;;  %v2133_v37 = vpop.f32.mrb[15].mxu1 }
 0xb81   :  { %v1377_v54 = vadd.f32 %v1375_v57, %v3140_v35 }
 0xb83   :  { %2736 = vtanh.f32 %v1377_v54 }
 0xb8d   :  { %v2737_v62 = vpop.eup %2736 }
 0xb8e   :  { %v1381_v4 = vmul.f32 %v2737_v62, %v1380_v58 }
 0xb90   :  { %v1382_v1 = vadd.f32 %v1381_v4, %v1379_v3 }
 0xb92   :  { %1765 = vst [vmem:[%s3404_s6 + $0x10] sm:$0xf0] %v1382_v1  ;;  %v1386_v8 = vrot.slane %v1382_v1, 4 }
 0xb94   :  { %1453 = vmatmul.mubr.f32.vlgmr.msra.gmra.mrb[20].mxu0 %v1386_v8 }
 0xb95   :  { %2611 = vmatpush1.bf16.msra.mxu0 %v2967_v16  ;;  %1616 = vmatprep.mubr.f32.mxu0 %v2862_v0 }
 0xb96   :  { %2613 = vmatprep.subr.bf16.mxu0 %v2970_v17 }
 0xb99   :  { %2615 = vmatpush1.bf16.msra.mxu0 %v2974_v22 }
 0xb9a   :  { %2617 = vmatprep.subr.bf16.mxu0 %v2980_v24 }
 0xb9d   :  { %2619 = vmatpush1.bf16.msra.mxu0 %v2985_v29 }
 0xb9e   :  { %2621 = vmatprep.subr.bf16.mxu0 %v2991_v31 }
 0xba1   :  { %2623 = vmatpush1.bf16.msra.mxu0 %v2996_v36 }
 0xba2   :  { %2625 = vmatprep.subr.bf16.mxu0 %v3002_v38 }
 0xba5   :  { %2627 = vmatpush1.bf16.msra.mxu0 %v3007_v43 }
 0xba6   :  { %2629 = vmatprep.subr.bf16.mxu0 %v3011_v44 }
 0xba9   :  { %2631 = vmatpush1.bf16.msra.mxu0 %v3014_v49 }
 0xbaa   :  { %2633 = vmatprep.subr.bf16.mxu0 %v3017_v50 }
 0xbad   :  { %2635 = vmatpush1.bf16.msra.mxu0 %v3020_v55 }
 0xbae   :  { %2637 = vmatprep.subr.bf16.mxu0 %v3023_v56 }
 0xbb1   :  { %2639 = vmatpush1.bf16.msra.mxu0 %v3026_v59 }
 0xc67   :  { %v1454_v16 = vpop.f32.mrb[20].mxu0 }
 0xc68   :  { %v1459_v17 = vadd.f32 %v1454_v16, %v3110_v61  ;;  %v1456_v22 = vpop.f32.mrb[21].mxu0 }
 0xc6a   :  { %v1766_v24 = vmul.f32 -1.442695, %v1459_v17 }
 0xc6c   :  { %2738 = vpow2.f32 %v1766_v24 }
 0xc76   :  { %v2739_v29 = vpop.eup %2738 }
 0xc77   :  { %v1467_v31 = vadd.f32 1.0, %v2739_v29 }
 0xc79   :  { %2740 = vrcp.f32 %v1467_v31 }
 0xc83   :  { %v2741_v36 = vpop.eup %2740 }
 0xc84   :  { %v1473_v38 = vmul.f32 %v2741_v36, %v1386_v8 }
 0xc86   :  { %2167 = vmatmul.mubr.f32.vlgmr.msra.gmra.mrb[16].mxu1 %v1473_v38 }
 0xc87   :  { %2642 = vmatpush3.bf16.msra.mxu1 %v3065_v5  ;;  %2201 = vmatprep.mubr.msk.f32.mxu1 %vm2865_vm4, %v2862_v0  ;;  %v1460_v0 = vadd.f32 %v1456_v22, %v3112_v63 }
 0xc88   :  { %2643 = vmatprep.subr.bf16.mxu1 %v2864_v2 }
 0xc89   :  { %v1767_v43 = vmul.f32 -1.442695, %v1460_v0 }
 0xc8b   :  { %2645 = vmatpush3.bf16.msra.mxu1 %v3069_v7  ;;  %2742 = vpow2.f32 %v1767_v43 }
 0xc8c   :  { %2646 = vmatprep.subr.bf16.mxu1 %v2864_v2 }
 0xc8f   :  { %2648 = vmatpush3.bf16.msra.mxu1 %v3073_v10 }
 0xc90   :  { %2649 = vmatprep.subr.bf16.mxu1 %v2864_v2 }
 0xc93   :  { %2651 = vmatpush3.bf16.msra.mxu1 %v3077_v14 }
 0xc94   :  { %2652 = vmatprep.subr.bf16.mxu1 %v2864_v2 }
 0xc95   :  { %v2743_v44 = vpop.eup %2742 }
 0xc96   :  { %v1468_v49 = vadd.f32 1.0, %v2743_v44 }
 0xc97   :  { %2654 = vmatpush3.bf16.msra.mxu1 %v3081_v19 }
 0xc98   :  { %2655 = vmatprep.subr.bf16.mxu1 %v2864_v2  ;;  %2744 = vrcp.f32 %v1468_v49 }
 0xc9b   :  { %2657 = vmatpush3.bf16.msra.mxu1 %v3085_v23 }
 0xc9c   :  { %2658 = vmatprep.subr.bf16.mxu1 %v2864_v2 }
 0xc9f   :  { %2660 = vmatpush3.bf16.msra.mxu1 %v3088_v27 }
 0xca0   :  { %2661 = vmatprep.subr.bf16.mxu1 %v2864_v2 }
 0xca2   :  { %v2745_v59 = vpop.eup %2744 }
 0xca3   :  { %2663 = vmatpush3.bf16.msra.mxu1 %v3094_v32  ;;  %v1547_v5 = vsub.f32 1.0, %v2745_v59  ;;  %v1546_v10 = vmul.f32 %v2745_v59, %v1386_v8 }
 0xd59   :  { %v1540_v50 = vpop.f32.mrb[16].mxu1 }
 0xd5a   :  { %v1544_v55 = vadd.f32 %v1540_v50, %v3138_v30  ;;  %v2168_v56 = vpop.f32.mrb[17].mxu1 }
 0xd5c   :  { %2746 = vtanh.f32 %v1544_v55 }
 0xd66   :  { %v2747_v7 = vpop.eup %2746 }
 0xd67   :  { %v1548_v14 = vmul.f32 %v2747_v7, %v1547_v5 }
 0xd69   :  { %v1549_v2 = vadd.f32 %v1548_v14, %v1546_v10 }
 0xd6b   :  { %1768 = vst [vmem:[%s3404_s6 + $0x18] sm:$0xf] %v1549_v2  ;;  %1617 = vmatmul.mubr.f32.vlgmr.msra.gmra.mrb[22].mxu0 %v1549_v2  ;;  %v1644_v12 = vrot.slane %v1549_v2, 4 }
 0xe3e   :  { %v1618_v19 = vpop.f32.mrb[22].mxu0 }
 0xe3f   :  { %v1625_v23 = vrot.slane %v1618_v19, 4  ;;  %v1620_v27 = vpop.f32.mrb[23].mxu0 }
 0xe40   :  { %v1626_v32 = vrot.slane %v1620_v27, 4 }
 0xe41   :  { %v1629_v35 = vadd.f32 %v1625_v23, %v3110_v61 }
 0xe42   :  { %v1630_v52 = vadd.f32 %v1626_v32, %v3112_v63 }
 0xe43   :  { %v1769_v41 = vmul.f32 -1.442695, %v1629_v35 }
 0xe44   :  { %v1770_v60 = vmul.f32 -1.442695, %v1630_v52 }
 0xe45   :  { %2748 = vpow2.f32 %v1769_v41 }
 0xe46   :  { %2750 = vpow2.f32 %v1770_v60 }
 0xe4f   :  { %v2749_v45 = vpop.eup %2748 }
 0xe50   :  { %v2751_v6 = vpop.eup %2750  ;;  %v1637_v9 = vadd.f32 1.0, %v2749_v45 }
 0xe51   :  { %v1638_v11 = vadd.f32 1.0, %v2751_v6 }
 0xe52   :  { %2752 = vrcp.f32 %v1637_v9 }
 0xe53   :  { %2754 = vrcp.f32 %v1638_v11 }
 0xe5c   :  { %v2753_v15 = vpop.eup %2752 }
 0xe5d   :  { %v2755_v18 = vpop.eup %2754  ;;  %v1646_v47 = vmul.f32 %v2753_v15, %v1644_v12 }
 0xe5e   :  { %v1725_v51 = vmul.f32 %v2755_v18, %v1644_v12  ;;  %v1726_v28 = vsub.f32 1.0, %v2755_v18 }
 0xe5f   :  { %v1648_v20 = vrot.slane %v1646_v47, 4 }
 0xe61   :  { %2202 = vmatmul.mubr.f32.vlgmr.msra.gmra.mrb[18].mxu1 %v1648_v20 }
 0xf34   :  { %v1716_v61 = vpop.f32.mrb[18].mxu1 }
 0xf35   :  { %v1721_v21 = vrot.slane %v1716_v61, 4  ;;  %v2203_v63 = vpop.f32.mrb[19].mxu1 }
 0xf37   :  { %v1723_v26 = vadd.f32 %v1721_v21, %v3138_v30 }
 0xf39   :  { %2756 = vtanh.f32 %v1723_v26 }
 0xf43   :  { %v2757_v33 = vpop.eup %2756 }
 0xf44   :  { %v1727_v40 = vmul.f32 %v2757_v33, %v1726_v28 }
 0xf46   :  { %v1728_v42 = vadd.f32 %v1727_v40, %v1725_v51 }
 0xf48   :  { %1771 = vst [vmem:[%s3404_s6 + $0x18] sm:$0xf0] %v1728_v42 }
 0xf49   :  { %1735 = vsyncpa [#allocation3], 1 }
 0xf4a   :  { %1736 = vsyncpa [#allocation5], 1 }
 0xf4b   :  { %1737 = vsyncpa [#allocation8], 1 }

</bundles_post_ra>
